<compile_context>
chip_gen: v5e
topology: v5e:2x2
jax: 0.10.0
libtpu: 0.0.40
codegen_flags: <defaults>
</compile_context>

<pallas_src>
import functools

import numpy as np
import jax
import jax.numpy as jnp
from jax.experimental import pallas as pl
from jax.experimental.pallas import tpu as pltpu

K_ENC = 15
K_DEC = 5
NEG_SLOPE = 0.1   # nn.LeakyReLU(negative_slope=0.1) in the reference module


def _leaky_relu(v):
    return jnp.where(v >= 0, v, NEG_SLOPE * v)


# ---------------------------------------------------------------------------
# Host-side constant matrices for the time-axis resampling (exact linear maps).
# ---------------------------------------------------------------------------
def _decimate_matrix(L):
    """(L, L//2) 0/1 matrix:  x[:, ::2] == x @ D   (time-last layout)."""
    D = np.zeros((L, L // 2), np.float32)
    D[2 * np.arange(L // 2), np.arange(L // 2)] = 1.0
    return jnp.asarray(D)


def _upsample_matrix(L):
    """(L, 2L) matrix so that x @ U == F.interpolate(x, scale_factor=2,
    mode='linear', align_corners=True) in the time-last layout."""
    Lo = 2 * L
    U = np.zeros((L, Lo), np.float32)
    if L == 1:
        U[0, :] = 1.0
        return jnp.asarray(U)
    pos = np.arange(Lo, dtype=np.float64) * (L - 1) / (Lo - 1)
    lo = np.clip(np.floor(pos).astype(np.int64), 0, L - 2)
    frac = (pos - lo).astype(np.float32)
    U[lo, np.arange(Lo)] = 1.0 - frac
    U[lo + 1, np.arange(Lo)] += frac
    return jnp.asarray(U)


# ---------------------------------------------------------------------------
# Fused UNet kernel (one batch element per grid step; everything stays in VMEM)
# ---------------------------------------------------------------------------
def _make_unet_kernel(n_layers):
    def conv_im2col(x, w_ref, b_ref, K):
        # x: (Cin, L) f32 ; w_ref: (Cout, K*Cin) bf16 ; b_ref: (Cout, 1) f32.
        cin, L = x.shape
        p_lo = (K - 1) // 2
        p_hi = K - 1 - p_lo
        parts = []
        if p_lo:
            parts.append(jnp.zeros((cin, p_lo), x.dtype))
        parts.append(x)
        if p_hi:
            parts.append(jnp.zeros((cin, p_hi), x.dtype))
        xp = jnp.concatenate(parts, axis=1) if len(parts) > 1 else x
        # Single MXU matmul with contraction K*Cin (row index = k*Cin + ci).
        cols = jnp.concatenate([xp[:, k:k + L] for k in range(K)], axis=0)
        y = jnp.dot(w_ref[...], cols.astype(jnp.bfloat16),
                    preferred_element_type=jnp.float32)
        return y + b_ref[...]

    def conv_cin1(x, w_ref, b_ref, K):
        # Cin == 1 first conv: VPU broadcast-MAC (an MXU matmul would be <1% filled).
        _, L = x.shape
        p_lo = (K - 1) // 2
        xp = jnp.concatenate(
            [jnp.zeros((1, p_lo), x.dtype), x,
             jnp.zeros((1, K - 1 - p_lo), x.dtype)], axis=1)
        acc = jnp.zeros((w_ref.shape[0], L), jnp.float32) + b_ref[...]
        for k in range(K):
            acc = acc + w_ref[:, k:k + 1] * xp[:, k:k + L]
        return acc

    def kernel(*refs):
        idx = 0
        x_ref = refs[idx]; idx += 1
        enc = [(refs[idx + 2 * i], refs[idx + 2 * i + 1]) for i in range(n_layers)]
        idx += 2 * n_layers
        mid_w, mid_b = refs[idx], refs[idx + 1]; idx += 2
        dec = [(refs[idx + 2 * i], refs[idx + 2 * i + 1]) for i in range(n_layers)]
        idx += 2 * n_layers
        out_w, out_b = refs[idx], refs[idx + 1]; idx += 2
        dec_mats = refs[idx:idx + n_layers]; idx += n_layers
        up_mats = refs[idx:idx + n_layers]; idx += n_layers
        o_ref = refs[idx]

        x_in = x_ref[0]                         # (1, T) f32, time on lanes
        o = x_in
        skips = []
        # ---- encoder ----
        for i in range(n_layers):
            w_ref, b_ref = enc[i]
            if i == 0:
                o = _leaky_relu(conv_cin1(o, w_ref, b_ref, K_ENC))
            else:
                o = _leaky_relu(conv_im2col(o, w_ref, b_ref, K_ENC))
            skips.append(o)
            # torch: o[:, :, ::2] -> 0/1 decimation matmul, stays in VMEM.
            o = jnp.dot(o, dec_mats[i][...], preferred_element_type=jnp.float32)
        # ---- middle ----
        o = _leaky_relu(conv_im2col(o, mid_w, mid_b, K_ENC))
        # ---- decoder ----
        for i in range(n_layers):
            # x2 linear align_corners=True upsample as a matmul.
            o = jnp.dot(o, up_mats[i][...], preferred_element_type=jnp.float32)
            o = jnp.concatenate([o, skips[n_layers - 1 - i]], axis=0)
            w_ref, b_ref = dec[i]
            o = _leaky_relu(conv_im2col(o, w_ref, b_ref, K_DEC))
        # ---- out: 1x1 conv with Cout=1 on the VPU (sublane reduction) ----
        o = jnp.concatenate([o, x_in], axis=0)             # (1 + ci, T)
        y = jnp.sum(out_w[...] * o, axis=0, keepdims=True) + out_b[...]
        o_ref[0] = jnp.tanh(y).astype(o_ref.dtype)

    return kernel


def unet_forward(params, x, n_layers):
    """x: (B, 1, T) in PyTorch NCL convention -> (B, 1, T)."""
    B, _, T = x.shape
    inputs = [x]
    for layer in params["enc"]:
        inputs += [layer["wk"], layer["b"]]
    inputs += [params["mid"]["wk"], params["mid"]["b"]]
    for layer in params["dec"]:
        inputs += [layer["wk"], layer["b"]]
    inputs += [params["out"]["wk"], params["out"]["b"]]
    inputs += list(params["dec_mats"])
    inputs += list(params["up_mats"])

    def full_spec(a):
        nd = a.ndim
        return pl.BlockSpec(a.shape, lambda b, _nd=nd: (0,) * _nd)

    in_specs = [pl.BlockSpec((1, 1, T), lambda b: (b, 0, 0))]
    in_specs += [full_spec(a) for a in inputs[1:]]

    return pl.pallas_call(
        _make_unet_kernel(n_layers),
        out_shape=jax.ShapeDtypeStruct((B, 1, T), x.dtype),
        grid=(B,),
        in_specs=in_specs,
        out_specs=pl.BlockSpec((1, 1, T), lambda b: (b, 0, 0)),
        compiler_params=pltpu.CompilerParams(
            dimension_semantics=("parallel",),
        ),
    )(*inputs)


# ---------------------------------------------------------------------------
# Parameter construction (deterministic, synthetic).  BatchNorm (eval mode,
# running stats) is folded into the conv weight / bias.
# ---------------------------------------------------------------------------
def _fold_conv_bn(key, cin, cout, K, with_bn=True):
    kw, kb, kg, kbeta, km, kv = jax.random.split(key, 6)
    w = jax.random.normal(kw, (cout, cin, K), jnp.float32) * 0.1   # PyTorch layout
    b = jax.random.normal(kb, (cout,), jnp.float32) * 0.1
    if with_bn:
        gamma = 1.0 + 0.1 * jax.random.normal(kg, (cout,), jnp.float32)
        beta = 0.1 * jax.random.normal(kbeta, (cout,), jnp.float32)
        mean = 0.1 * jax.random.normal(km, (cout,), jnp.float32)
        var = 1.0 + 0.1 * jnp.abs(jax.random.normal(kv, (cout,), jnp.float32))
        s = gamma / jnp.sqrt(var + 1e-5)
        w = w * s[:, None, None]
        b = b * s + beta - mean * s
    # (Cout, K*Cin) with column index k*Cin + ci (matches the kernel's im2col).
    w2d = jnp.transpose(w, (0, 2, 1)).reshape(cout, K * cin)
    return w2d, b.reshape(cout, 1)


def build_unet_params(key, n_layers, channels_interval, T):
    ci = channels_interval
    enc_in = [1] + [i * ci for i in range(1, n_layers)]
    enc_out = [i * ci for i in range(1, n_layers + 1)]
    dec_in = [(2 * i + 1) * ci for i in range(1, n_layers)] + [2 * n_layers * ci]
    dec_in = dec_in[::-1]
    dec_out = enc_out[::-1]

    keys = jax.random.split(key, 2 * n_layers + 2)
    params = {"enc": [], "dec": []}
    for i in range(n_layers):
        w2d, b = _fold_conv_bn(keys[i], enc_in[i], enc_out[i], K_ENC)
        # First conv (Cin=1) runs on the VPU in f32; the rest feed the MXU in bf16.
        wk = w2d if i == 0 else w2d.astype(jnp.bfloat16)
        params["enc"].append({"w2d": w2d, "wk": wk, "b": b})
    mid_c = n_layers * ci
    w2d, b = _fold_conv_bn(keys[n_layers], mid_c, mid_c, K_ENC)
    params["mid"] = {"w2d": w2d, "wk": w2d.astype(jnp.bfloat16), "b": b}
    for i in range(n_layers):
        w2d, b = _fold_conv_bn(keys[n_layers + 1 + i], dec_in[i], dec_out[i], K_DEC)
        params["dec"].append({"w2d": w2d, "wk": w2d.astype(jnp.bfloat16), "b": b})
    w2d, b = _fold_conv_bn(keys[-1], 1 + ci, 1, 1, with_bn=False)
    # Final 1x1 conv is a VPU sublane reduction: store the weight as (Cin, 1) f32.
    params["out"] = {"w2d": w2d, "wk": w2d.T, "b": b}
    params["dec_mats"] = tuple(_decimate_matrix(T >> i) for i in range(n_layers))
    params["up_mats"] = tuple(
        _upsample_matrix(T >> (n_layers - i)) for i in range(n_layers))
    return params


# ---------------------------------------------------------------------------
# Pure-JAX (f32) reference with identical semantics, for validation.
# ---------------------------------------------------------------------------
def unet_reference(params, x, n_layers):
    def conv(o, w2d, b, K):          # o: (B, C, L), NCL like PyTorch
        _, _, L = o.shape
        p = (K - 1) // 2
        xp = jnp.pad(o, ((0, 0), (0, 0), (p, K - 1 - p)))
        cols = jnp.concatenate([xp[:, :, k:k + L] for k in range(K)], axis=1)
        return jnp.einsum("oc,bcl->bol", w2d, cols) + b[None]

    def upsample(o):                 # x2 linear, align_corners=True
        _, _, L = o.shape
        Lo = 2 * L
        pos = jnp.arange(Lo, dtype=jnp.float32) * (L - 1) / (Lo - 1)
        lo = jnp.clip(jnp.floor(pos).astype(jnp.int32), 0, L - 2)
        frac = pos - lo.astype(jnp.float32)
        return o[:, :, lo] * (1 - frac) + o[:, :, lo + 1] * frac

    o = x
    skips = []
    for i in range(n_layers):
        o = _leaky_relu(conv(o, params["enc"][i]["w2d"], params["enc"][i]["b"], K_ENC))
        skips.append(o)
        o = o[:, :, ::2]
    o = _leaky_relu(conv(o, params["mid"]["w2d"], params["mid"]["b"], K_ENC))
    for i in range(n_layers):
        o = upsample(o)
        o = jnp.concatenate([o, skips[n_layers - 1 - i]], axis=1)
        o = _leaky_relu(conv(o, params["dec"][i]["w2d"], params["dec"][i]["b"], K_DEC))
    o = jnp.concatenate([o, x], axis=1)
    o = jnp.tanh(conv(o, params["out"]["w2d"], params["out"]["b"], 1))
    return o


# ---------------------------------------------------------------------------
if __name__ == "__main__":
    # Small configuration consistent with the module (constructor-configurable):
    # n_layers=3, channels_interval=8.  T must be divisible by 2**n_layers.
    n_layers = 3
    channels_interval = 8
    B, T = 2, 128

    key = jax.random.PRNGKey(0)
    kx, kp = jax.random.split(key)
    x = jax.random.normal(kx, (B, 1, T), jnp.float32)
    params = build_unet_params(kp, n_layers, channels_interval, T)

    fwd = jax.jit(functools.partial(unet_forward, n_layers=n_layers))
    out = fwd(params, x)
    jax.block_until_ready(out)

    assert out.shape == (B, 1, T), out.shape
    assert bool(jnp.all(jnp.isfinite(out)))

    ref = unet_reference(params, x, n_layers)
    err = float(jnp.max(jnp.abs(out - ref)))
    assert err < 5e-2, f"max abs error vs f32 reference: {err}"

    print("KERNEL_OK")
</pallas_src>

<mosaic_0001>
module attributes {stable_mosaic.version = 11 : i64} {
  func.func @kernel(%arg0: i32, %arg1: memref<1x1x128xf32, #tpu.memory_space<vmem>>, %arg2: memref<8x15xf32, #tpu.memory_space<vmem>>, %arg3: memref<8x1xf32, #tpu.memory_space<vmem>>, %arg4: memref<16x120xbf16, #tpu.memory_space<vmem>>, %arg5: memref<16x1xf32, #tpu.memory_space<vmem>>, %arg6: memref<24x240xbf16, #tpu.memory_space<vmem>>, %arg7: memref<24x1xf32, #tpu.memory_space<vmem>>, %arg8: memref<24x360xbf16, #tpu.memory_space<vmem>>, %arg9: memref<24x1xf32, #tpu.memory_space<vmem>>, %arg10: memref<24x240xbf16, #tpu.memory_space<vmem>>, %arg11: memref<24x1xf32, #tpu.memory_space<vmem>>, %arg12: memref<16x200xbf16, #tpu.memory_space<vmem>>, %arg13: memref<16x1xf32, #tpu.memory_space<vmem>>, %arg14: memref<8x120xbf16, #tpu.memory_space<vmem>>, %arg15: memref<8x1xf32, #tpu.memory_space<vmem>>, %arg16: memref<9x1xf32, #tpu.memory_space<vmem>>, %arg17: memref<1x1xf32, #tpu.memory_space<vmem>>, %arg18: memref<128x64xf32, #tpu.memory_space<vmem>>, %arg19: memref<64x32xf32, #tpu.memory_space<vmem>>, %arg20: memref<32x16xf32, #tpu.memory_space<vmem>>, %arg21: memref<16x32xf32, #tpu.memory_space<vmem>>, %arg22: memref<32x64xf32, #tpu.memory_space<vmem>>, %arg23: memref<64x128xf32, #tpu.memory_space<vmem>>, %arg24: memref<1x1x128xf32, #tpu.memory_space<vmem>>) attributes {dimension_semantics = [#tpu.dimension_semantics<parallel>], iteration_bounds = array<i64: 2>, scalar_prefetch = 0 : i64, scratch_operands = 0 : i64, tpu.core_type = #tpu.core_type<tc>, window_params = [{transform_indices = @transform_0, window_bounds = array<i64: 1, 1, 128>}, {pipeline_mode = #tpu.pipeline_mode<synchronous>, transform_indices = @transform_1, window_bounds = array<i64: 8, 15>}, {pipeline_mode = #tpu.pipeline_mode<synchronous>, transform_indices = @transform_2, window_bounds = array<i64: 8, 1>}, {pipeline_mode = #tpu.pipeline_mode<synchronous>, transform_indices = @transform_3, window_bounds = array<i64: 16, 120>}, {pipeline_mode = #tpu.pipeline_mode<synchronous>, transform_indices = @transform_4, window_bounds = array<i64: 16, 1>}, {pipeline_mode = #tpu.pipeline_mode<synchronous>, transform_indices = @transform_5, window_bounds = array<i64: 24, 240>}, {pipeline_mode = #tpu.pipeline_mode<synchronous>, transform_indices = @transform_6, window_bounds = array<i64: 24, 1>}, {pipeline_mode = #tpu.pipeline_mode<synchronous>, transform_indices = @transform_7, window_bounds = array<i64: 24, 360>}, {pipeline_mode = #tpu.pipeline_mode<synchronous>, transform_indices = @transform_8, window_bounds = array<i64: 24, 1>}, {pipeline_mode = #tpu.pipeline_mode<synchronous>, transform_indices = @transform_9, window_bounds = array<i64: 24, 240>}, {pipeline_mode = #tpu.pipeline_mode<synchronous>, transform_indices = @transform_10, window_bounds = array<i64: 24, 1>}, {pipeline_mode = #tpu.pipeline_mode<synchronous>, transform_indices = @transform_11, window_bounds = array<i64: 16, 200>}, {pipeline_mode = #tpu.pipeline_mode<synchronous>, transform_indices = @transform_12, window_bounds = array<i64: 16, 1>}, {pipeline_mode = #tpu.pipeline_mode<synchronous>, transform_indices = @transform_13, window_bounds = array<i64: 8, 120>}, {pipeline_mode = #tpu.pipeline_mode<synchronous>, transform_indices = @transform_14, window_bounds = array<i64: 8, 1>}, {pipeline_mode = #tpu.pipeline_mode<synchronous>, transform_indices = @transform_15, window_bounds = array<i64: 9, 1>}, {pipeline_mode = #tpu.pipeline_mode<synchronous>, transform_indices = @transform_16, window_bounds = array<i64: 1, 1>}, {pipeline_mode = #tpu.pipeline_mode<synchronous>, transform_indices = @transform_17, window_bounds = array<i64: 128, 64>}, {pipeline_mode = #tpu.pipeline_mode<synchronous>, transform_indices = @transform_18, window_bounds = array<i64: 64, 32>}, {pipeline_mode = #tpu.pipeline_mode<synchronous>, transform_indices = @transform_19, window_bounds = array<i64: 32, 16>}, {pipeline_mode = #tpu.pipeline_mode<synchronous>, transform_indices = @transform_20, window_bounds = array<i64: 16, 32>}, {pipeline_mode = #tpu.pipeline_mode<synchronous>, transform_indices = @transform_21, window_bounds = array<i64: 32, 64>}, {pipeline_mode = #tpu.pipeline_mode<synchronous>, transform_indices = @transform_22, window_bounds = array<i64: 64, 128>}, {transform_indices = @transform_23, window_bounds = array<i64: 1, 1, 128>}]} {
    %c0 = arith.constant 0 : index
    %c0_0 = arith.constant 0 : index
    %c0_1 = arith.constant 0 : index
    %0 = vector.load %arg1[%c0, %c0_0, %c0_1] : memref<1x1x128xf32, #tpu.memory_space<vmem>>, vector<1x1x128xf32>
    %1 = vector.shape_cast %0 : vector<1x1x128xf32> to vector<1x128xf32>
    %cst = arith.constant 0.000000e+00 : f32
    %2 = vector.broadcast %cst : f32 to vector<1x7xf32>
    %cst_2 = arith.constant 0.000000e+00 : f32
    %3 = vector.broadcast %cst_2 : f32 to vector<1x7xf32>
    %4 = tpu.concatenate %2, %1, %3 in 1 : vector<1x7xf32>, vector<1x128xf32>, vector<1x7xf32> -> vector<1x142xf32>
    %cst_3 = arith.constant 0.000000e+00 : f32
    %5 = vector.broadcast %cst_3 : f32 to vector<8x128xf32>
    %c0_4 = arith.constant 0 : index
    %c0_5 = arith.constant 0 : index
    %6 = vector.load %arg3[%c0_4, %c0_5] : memref<8x1xf32, #tpu.memory_space<vmem>>, vector<8x1xf32>
    %7 = vector.broadcast %6 : vector<8x1xf32> to vector<8x128xf32>
    %8 = arith.addf %5, %7 : vector<8x128xf32>
    %c0_6 = arith.constant 0 : index
    %c0_7 = arith.constant 0 : index
    %9 = vector.load %arg2[%c0_6, %c0_7] : memref<8x15xf32, #tpu.memory_space<vmem>>, vector<8x1xf32>
    %10 = vector.extract_strided_slice %4 {offsets = [0, 0], sizes = [1, 128], strides = [1, 1]} : vector<1x142xf32> to vector<1x128xf32>
    %11 = vector.broadcast %9 : vector<8x1xf32> to vector<8x128xf32>
    %12 = vector.broadcast %10 : vector<1x128xf32> to vector<8x128xf32>
    %13 = arith.mulf %11, %12 : vector<8x128xf32>
    %14 = arith.addf %8, %13 : vector<8x128xf32>
    %c0_8 = arith.constant 0 : index
    %c1 = arith.constant 1 : index
    %15 = vector.load %arg2[%c0_8, %c1] : memref<8x15xf32, #tpu.memory_space<vmem>>, vector<8x1xf32>
    %16 = vector.extract_strided_slice %4 {offsets = [0, 1], sizes = [1, 128], strides = [1, 1]} : vector<1x142xf32> to vector<1x128xf32>
    %17 = vector.broadcast %15 : vector<8x1xf32> to vector<8x128xf32>
    %18 = vector.broadcast %16 : vector<1x128xf32> to vector<8x128xf32>
    %19 = arith.mulf %17, %18 : vector<8x128xf32>
    %20 = arith.addf %14, %19 : vector<8x128xf32>
    %c0_9 = arith.constant 0 : index
    %c2 = arith.constant 2 : index
    %21 = vector.load %arg2[%c0_9, %c2] : memref<8x15xf32, #tpu.memory_space<vmem>>, vector<8x1xf32>
    %22 = vector.extract_strided_slice %4 {offsets = [0, 2], sizes = [1, 128], strides = [1, 1]} : vector<1x142xf32> to vector<1x128xf32>
    %23 = vector.broadcast %21 : vector<8x1xf32> to vector<8x128xf32>
    %24 = vector.broadcast %22 : vector<1x128xf32> to vector<8x128xf32>
    %25 = arith.mulf %23, %24 : vector<8x128xf32>
    %26 = arith.addf %20, %25 : vector<8x128xf32>
    %c0_10 = arith.constant 0 : index
    %c3 = arith.constant 3 : index
    %27 = vector.load %arg2[%c0_10, %c3] : memref<8x15xf32, #tpu.memory_space<vmem>>, vector<8x1xf32>
    %28 = vector.extract_strided_slice %4 {offsets = [0, 3], sizes = [1, 128], strides = [1, 1]} : vector<1x142xf32> to vector<1x128xf32>
    %29 = vector.broadcast %27 : vector<8x1xf32> to vector<8x128xf32>
    %30 = vector.broadcast %28 : vector<1x128xf32> to vector<8x128xf32>
    %31 = arith.mulf %29, %30 : vector<8x128xf32>
    %32 = arith.addf %26, %31 : vector<8x128xf32>
    %c0_11 = arith.constant 0 : index
    %c4 = arith.constant 4 : index
    %33 = vector.load %arg2[%c0_11, %c4] : memref<8x15xf32, #tpu.memory_space<vmem>>, vector<8x1xf32>
    %34 = vector.extract_strided_slice %4 {offsets = [0, 4], sizes = [1, 128], strides = [1, 1]} : vector<1x142xf32> to vector<1x128xf32>
    %35 = vector.broadcast %33 : vector<8x1xf32> to vector<8x128xf32>
    %36 = vector.broadcast %34 : vector<1x128xf32> to vector<8x128xf32>
    %37 = arith.mulf %35, %36 : vector<8x128xf32>
    %38 = arith.addf %32, %37 : vector<8x128xf32>
    %c0_12 = arith.constant 0 : index
    %c5 = arith.constant 5 : index
    %39 = vector.load %arg2[%c0_12, %c5] : memref<8x15xf32, #tpu.memory_space<vmem>>, vector<8x1xf32>
    %40 = vector.extract_strided_slice %4 {offsets = [0, 5], sizes = [1, 128], strides = [1, 1]} : vector<1x142xf32> to vector<1x128xf32>
    %41 = vector.broadcast %39 : vector<8x1xf32> to vector<8x128xf32>
    %42 = vector.broadcast %40 : vector<1x128xf32> to vector<8x128xf32>
    %43 = arith.mulf %41, %42 : vector<8x128xf32>
    %44 = arith.addf %38, %43 : vector<8x128xf32>
    %c0_13 = arith.constant 0 : index
    %c6 = arith.constant 6 : index
    %45 = vector.load %arg2[%c0_13, %c6] : memref<8x15xf32, #tpu.memory_space<vmem>>, vector<8x1xf32>
    %46 = vector.extract_strided_slice %4 {offsets = [0, 6], sizes = [1, 128], strides = [1, 1]} : vector<1x142xf32> to vector<1x128xf32>
    %47 = vector.broadcast %45 : vector<8x1xf32> to vector<8x128xf32>
    %48 = vector.broadcast %46 : vector<1x128xf32> to vector<8x128xf32>
    %49 = arith.mulf %47, %48 : vector<8x128xf32>
    %50 = arith.addf %44, %49 : vector<8x128xf32>
    %c0_14 = arith.constant 0 : index
    %c7 = arith.constant 7 : index
    %51 = vector.load %arg2[%c0_14, %c7] : memref<8x15xf32, #tpu.memory_space<vmem>>, vector<8x1xf32>
    %52 = vector.extract_strided_slice %4 {offsets = [0, 7], sizes = [1, 128], strides = [1, 1]} : vector<1x142xf32> to vector<1x128xf32>
    %53 = vector.broadcast %51 : vector<8x1xf32> to vector<8x128xf32>
    %54 = vector.broadcast %52 : vector<1x128xf32> to vector<8x128xf32>
    %55 = arith.mulf %53, %54 : vector<8x128xf32>
    %56 = arith.addf %50, %55 : vector<8x128xf32>
    %c0_15 = arith.constant 0 : index
    %c8 = arith.constant 8 : index
    %57 = vector.load %arg2[%c0_15, %c8] : memref<8x15xf32, #tpu.memory_space<vmem>>, vector<8x1xf32>
    %58 = vector.extract_strided_slice %4 {offsets = [0, 8], sizes = [1, 128], strides = [1, 1]} : vector<1x142xf32> to vector<1x128xf32>
    %59 = vector.broadcast %57 : vector<8x1xf32> to vector<8x128xf32>
    %60 = vector.broadcast %58 : vector<1x128xf32> to vector<8x128xf32>
    %61 = arith.mulf %59, %60 : vector<8x128xf32>
    %62 = arith.addf %56, %61 : vector<8x128xf32>
    %c0_16 = arith.constant 0 : index
    %c9 = arith.constant 9 : index
    %63 = vector.load %arg2[%c0_16, %c9] : memref<8x15xf32, #tpu.memory_space<vmem>>, vector<8x1xf32>
    %64 = vector.extract_strided_slice %4 {offsets = [0, 9], sizes = [1, 128], strides = [1, 1]} : vector<1x142xf32> to vector<1x128xf32>
    %65 = vector.broadcast %63 : vector<8x1xf32> to vector<8x128xf32>
    %66 = vector.broadcast %64 : vector<1x128xf32> to vector<8x128xf32>
    %67 = arith.mulf %65, %66 : vector<8x128xf32>
    %68 = arith.addf %62, %67 : vector<8x128xf32>
    %c0_17 = arith.constant 0 : index
    %c10 = arith.constant 10 : index
    %69 = vector.load %arg2[%c0_17, %c10] : memref<8x15xf32, #tpu.memory_space<vmem>>, vector<8x1xf32>
    %70 = vector.extract_strided_slice %4 {offsets = [0, 10], sizes = [1, 128], strides = [1, 1]} : vector<1x142xf32> to vector<1x128xf32>
    %71 = vector.broadcast %69 : vector<8x1xf32> to vector<8x128xf32>
    %72 = vector.broadcast %70 : vector<1x128xf32> to vector<8x128xf32>
    %73 = arith.mulf %71, %72 : vector<8x128xf32>
    %74 = arith.addf %68, %73 : vector<8x128xf32>
    %c0_18 = arith.constant 0 : index
    %c11 = arith.constant 11 : index
    %75 = vector.load %arg2[%c0_18, %c11] : memref<8x15xf32, #tpu.memory_space<vmem>>, vector<8x1xf32>
    %76 = vector.extract_strided_slice %4 {offsets = [0, 11], sizes = [1, 128], strides = [1, 1]} : vector<1x142xf32> to vector<1x128xf32>
    %77 = vector.broadcast %75 : vector<8x1xf32> to vector<8x128xf32>
    %78 = vector.broadcast %76 : vector<1x128xf32> to vector<8x128xf32>
    %79 = arith.mulf %77, %78 : vector<8x128xf32>
    %80 = arith.addf %74, %79 : vector<8x128xf32>
    %c0_19 = arith.constant 0 : index
    %c12 = arith.constant 12 : index
    %81 = vector.load %arg2[%c0_19, %c12] : memref<8x15xf32, #tpu.memory_space<vmem>>, vector<8x1xf32>
    %82 = vector.extract_strided_slice %4 {offsets = [0, 12], sizes = [1, 128], strides = [1, 1]} : vector<1x142xf32> to vector<1x128xf32>
    %83 = vector.broadcast %81 : vector<8x1xf32> to vector<8x128xf32>
    %84 = vector.broadcast %82 : vector<1x128xf32> to vector<8x128xf32>
    %85 = arith.mulf %83, %84 : vector<8x128xf32>
    %86 = arith.addf %80, %85 : vector<8x128xf32>
    %c0_20 = arith.constant 0 : index
    %c13 = arith.constant 13 : index
    %87 = vector.load %arg2[%c0_20, %c13] : memref<8x15xf32, #tpu.memory_space<vmem>>, vector<8x1xf32>
    %88 = vector.extract_strided_slice %4 {offsets = [0, 13], sizes = [1, 128], strides = [1, 1]} : vector<1x142xf32> to vector<1x128xf32>
    %89 = vector.broadcast %87 : vector<8x1xf32> to vector<8x128xf32>
    %90 = vector.broadcast %88 : vector<1x128xf32> to vector<8x128xf32>
    %91 = arith.mulf %89, %90 : vector<8x128xf32>
    %92 = arith.addf %86, %91 : vector<8x128xf32>
    %c0_21 = arith.constant 0 : index
    %c14 = arith.constant 14 : index
    %93 = vector.load %arg2[%c0_21, %c14] : memref<8x15xf32, #tpu.memory_space<vmem>>, vector<8x1xf32>
    %94 = vector.extract_strided_slice %4 {offsets = [0, 14], sizes = [1, 128], strides = [1, 1]} : vector<1x142xf32> to vector<1x128xf32>
    %95 = vector.broadcast %93 : vector<8x1xf32> to vector<8x128xf32>
    %96 = vector.broadcast %94 : vector<1x128xf32> to vector<8x128xf32>
    %97 = arith.mulf %95, %96 : vector<8x128xf32>
    %98 = arith.addf %92, %97 : vector<8x128xf32>
    %cst_22 = arith.constant 0.000000e+00 : f32
    %99 = vector.broadcast %cst_22 : f32 to vector<8x128xf32>
    %100 = arith.cmpf oge, %98, %99 : vector<8x128xf32>
    %cst_23 = arith.constant 1.000000e-01 : f32
    %101 = vector.broadcast %cst_23 : f32 to vector<8x128xf32>
    %102 = arith.mulf %101, %98 : vector<8x128xf32>
    %103 = arith.select %100, %98, %102 : vector<8x128xi1>, vector<8x128xf32>
    %c0_24 = arith.constant 0 : index
    %c0_25 = arith.constant 0 : index
    %104 = vector.load %arg18[%c0_24, %c0_25] : memref<128x64xf32, #tpu.memory_space<vmem>>, vector<128x64xf32>
    %cst_26 = arith.constant dense<0.000000e+00> : vector<8x64xf32>
    %105 = tpu.matmul %103, %104, %cst_26 {dimension_numbers = #tpu.dot_dimension_numbers<[1], [0], [0], [1], [0, 0, 1, 1], [], []>} : vector<8x128xf32>, vector<128x64xf32>, vector<8x64xf32> -> vector<8x64xf32>
    %cst_27 = arith.constant 0.000000e+00 : f32
    %106 = vector.broadcast %cst_27 : f32 to vector<8x7xf32>
    %cst_28 = arith.constant 0.000000e+00 : f32
    %107 = vector.broadcast %cst_28 : f32 to vector<8x7xf32>
    %108 = tpu.concatenate %106, %105, %107 in 1 : vector<8x7xf32>, vector<8x64xf32>, vector<8x7xf32> -> vector<8x78xf32>
    %109 = vector.extract_strided_slice %108 {offsets = [0, 0], sizes = [8, 64], strides = [1, 1]} : vector<8x78xf32> to vector<8x64xf32>
    %110 = vector.extract_strided_slice %108 {offsets = [0, 1], sizes = [8, 64], strides = [1, 1]} : vector<8x78xf32> to vector<8x64xf32>
    %111 = vector.extract_strided_slice %108 {offsets = [0, 2], sizes = [8, 64], strides = [1, 1]} : vector<8x78xf32> to vector<8x64xf32>
    %112 = vector.extract_strided_slice %108 {offsets = [0, 3], sizes = [8, 64], strides = [1, 1]} : vector<8x78xf32> to vector<8x64xf32>
    %113 = vector.extract_strided_slice %108 {offsets = [0, 4], sizes = [8, 64], strides = [1, 1]} : vector<8x78xf32> to vector<8x64xf32>
    %114 = vector.extract_strided_slice %108 {offsets = [0, 5], sizes = [8, 64], strides = [1, 1]} : vector<8x78xf32> to vector<8x64xf32>
    %115 = vector.extract_strided_slice %108 {offsets = [0, 6], sizes = [8, 64], strides = [1, 1]} : vector<8x78xf32> to vector<8x64xf32>
    %116 = vector.extract_strided_slice %108 {offsets = [0, 7], sizes = [8, 64], strides = [1, 1]} : vector<8x78xf32> to vector<8x64xf32>
    %117 = vector.extract_strided_slice %108 {offsets = [0, 8], sizes = [8, 64], strides = [1, 1]} : vector<8x78xf32> to vector<8x64xf32>
    %118 = vector.extract_strided_slice %108 {offsets = [0, 9], sizes = [8, 64], strides = [1, 1]} : vector<8x78xf32> to vector<8x64xf32>
    %119 = vector.extract_strided_slice %108 {offsets = [0, 10], sizes = [8, 64], strides = [1, 1]} : vector<8x78xf32> to vector<8x64xf32>
    %120 = vector.extract_strided_slice %108 {offsets = [0, 11], sizes = [8, 64], strides = [1, 1]} : vector<8x78xf32> to vector<8x64xf32>
    %121 = vector.extract_strided_slice %108 {offsets = [0, 12], sizes = [8, 64], strides = [1, 1]} : vector<8x78xf32> to vector<8x64xf32>
    %122 = vector.extract_strided_slice %108 {offsets = [0, 13], sizes = [8, 64], strides = [1, 1]} : vector<8x78xf32> to vector<8x64xf32>
    %123 = vector.extract_strided_slice %108 {offsets = [0, 14], sizes = [8, 64], strides = [1, 1]} : vector<8x78xf32> to vector<8x64xf32>
    %124 = tpu.concatenate %109, %110, %111, %112, %113, %114, %115, %116, %117, %118, %119, %120, %121, %122, %123 in 0 : vector<8x64xf32>, vector<8x64xf32>, vector<8x64xf32>, vector<8x64xf32>, vector<8x64xf32>, vector<8x64xf32>, vector<8x64xf32>, vector<8x64xf32>, vector<8x64xf32>, vector<8x64xf32>, vector<8x64xf32>, vector<8x64xf32>, vector<8x64xf32>, vector<8x64xf32>, vector<8x64xf32> -> vector<120x64xf32>
    %c0_29 = arith.constant 0 : index
    %c0_30 = arith.constant 0 : index
    %125 = vector.load %arg4[%c0_29, %c0_30] : memref<16x120xbf16, #tpu.memory_space<vmem>>, vector<16x120xbf16>
    %126 = arith.truncf %124 : vector<120x64xf32> to vector<120x64xbf16>
    %cst_31 = arith.constant dense<0.000000e+00> : vector<16x64xf32>
    %127 = tpu.matmul %125, %126, %cst_31 {dimension_numbers = #tpu.dot_dimension_numbers<[1], [0], [0], [1], [0, 0, 1, 1], [], []>} : vector<16x120xbf16>, vector<120x64xbf16>, vector<16x64xf32> -> vector<16x64xf32>
    %c0_32 = arith.constant 0 : index
    %c0_33 = arith.constant 0 : index
    %128 = vector.load %arg5[%c0_32, %c0_33] : memref<16x1xf32, #tpu.memory_space<vmem>>, vector<16x1xf32>
    %129 = vector.broadcast %128 : vector<16x1xf32> to vector<16x64xf32>
    %130 = arith.addf %127, %129 : vector<16x64xf32>
    %cst_34 = arith.constant 0.000000e+00 : f32
    %131 = vector.broadcast %cst_34 : f32 to vector<16x64xf32>
    %132 = arith.cmpf oge, %130, %131 : vector<16x64xf32>
    %cst_35 = arith.constant 1.000000e-01 : f32
    %133 = vector.broadcast %cst_35 : f32 to vector<16x64xf32>
    %134 = arith.mulf %133, %130 : vector<16x64xf32>
    %135 = arith.select %132, %130, %134 : vector<16x64xi1>, vector<16x64xf32>
    %c0_36 = arith.constant 0 : index
    %c0_37 = arith.constant 0 : index
    %136 = vector.load %arg19[%c0_36, %c0_37] : memref<64x32xf32, #tpu.memory_space<vmem>>, vector<64x32xf32>
    %cst_38 = arith.constant dense<0.000000e+00> : vector<16x32xf32>
    %137 = tpu.matmul %135, %136, %cst_38 {dimension_numbers = #tpu.dot_dimension_numbers<[1], [0], [0], [1], [0, 0, 1, 1], [], []>} : vector<16x64xf32>, vector<64x32xf32>, vector<16x32xf32> -> vector<16x32xf32>
    %cst_39 = arith.constant 0.000000e+00 : f32
    %138 = vector.broadcast %cst_39 : f32 to vector<16x7xf32>
    %cst_40 = arith.constant 0.000000e+00 : f32
    %139 = vector.broadcast %cst_40 : f32 to vector<16x7xf32>
    %140 = tpu.concatenate %138, %137, %139 in 1 : vector<16x7xf32>, vector<16x32xf32>, vector<16x7xf32> -> vector<16x46xf32>
    %141 = vector.extract_strided_slice %140 {offsets = [0, 0], sizes = [16, 32], strides = [1, 1]} : vector<16x46xf32> to vector<16x32xf32>
    %142 = vector.extract_strided_slice %140 {offsets = [0, 1], sizes = [16, 32], strides = [1, 1]} : vector<16x46xf32> to vector<16x32xf32>
    %143 = vector.extract_strided_slice %140 {offsets = [0, 2], sizes = [16, 32], strides = [1, 1]} : vector<16x46xf32> to vector<16x32xf32>
    %144 = vector.extract_strided_slice %140 {offsets = [0, 3], sizes = [16, 32], strides = [1, 1]} : vector<16x46xf32> to vector<16x32xf32>
    %145 = vector.extract_strided_slice %140 {offsets = [0, 4], sizes = [16, 32], strides = [1, 1]} : vector<16x46xf32> to vector<16x32xf32>
    %146 = vector.extract_strided_slice %140 {offsets = [0, 5], sizes = [16, 32], strides = [1, 1]} : vector<16x46xf32> to vector<16x32xf32>
    %147 = vector.extract_strided_slice %140 {offsets = [0, 6], sizes = [16, 32], strides = [1, 1]} : vector<16x46xf32> to vector<16x32xf32>
    %148 = vector.extract_strided_slice %140 {offsets = [0, 7], sizes = [16, 32], strides = [1, 1]} : vector<16x46xf32> to vector<16x32xf32>
    %149 = vector.extract_strided_slice %140 {offsets = [0, 8], sizes = [16, 32], strides = [1, 1]} : vector<16x46xf32> to vector<16x32xf32>
    %150 = vector.extract_strided_slice %140 {offsets = [0, 9], sizes = [16, 32], strides = [1, 1]} : vector<16x46xf32> to vector<16x32xf32>
    %151 = vector.extract_strided_slice %140 {offsets = [0, 10], sizes = [16, 32], strides = [1, 1]} : vector<16x46xf32> to vector<16x32xf32>
    %152 = vector.extract_strided_slice %140 {offsets = [0, 11], sizes = [16, 32], strides = [1, 1]} : vector<16x46xf32> to vector<16x32xf32>
    %153 = vector.extract_strided_slice %140 {offsets = [0, 12], sizes = [16, 32], strides = [1, 1]} : vector<16x46xf32> to vector<16x32xf32>
    %154 = vector.extract_strided_slice %140 {offsets = [0, 13], sizes = [16, 32], strides = [1, 1]} : vector<16x46xf32> to vector<16x32xf32>
    %155 = vector.extract_strided_slice %140 {offsets = [0, 14], sizes = [16, 32], strides = [1, 1]} : vector<16x46xf32> to vector<16x32xf32>
    %156 = tpu.concatenate %141, %142, %143, %144, %145, %146, %147, %148, %149, %150, %151, %152, %153, %154, %155 in 0 : vector<16x32xf32>, vector<16x32xf32>, vector<16x32xf32>, vector<16x32xf32>, vector<16x32xf32>, vector<16x32xf32>, vector<16x32xf32>, vector<16x32xf32>, vector<16x32xf32>, vector<16x32xf32>, vector<16x32xf32>, vector<16x32xf32>, vector<16x32xf32>, vector<16x32xf32>, vector<16x32xf32> -> vector<240x32xf32>
    %c0_41 = arith.constant 0 : index
    %c0_42 = arith.constant 0 : index
    %157 = vector.load %arg6[%c0_41, %c0_42] : memref<24x240xbf16, #tpu.memory_space<vmem>>, vector<24x240xbf16>
    %158 = arith.truncf %156 : vector<240x32xf32> to vector<240x32xbf16>
    %cst_43 = arith.constant dense<0.000000e+00> : vector<24x32xf32>
    %159 = tpu.matmul %157, %158, %cst_43 {dimension_numbers = #tpu.dot_dimension_numbers<[1], [0], [0], [1], [0, 0, 1, 1], [], []>} : vector<24x240xbf16>, vector<240x32xbf16>, vector<24x32xf32> -> vector<24x32xf32>
    %c0_44 = arith.constant 0 : index
    %c0_45 = arith.constant 0 : index
    %160 = vector.load %arg7[%c0_44, %c0_45] : memref<24x1xf32, #tpu.memory_space<vmem>>, vector<24x1xf32>
    %161 = vector.broadcast %160 : vector<24x1xf32> to vector<24x32xf32>
    %162 = arith.addf %159, %161 : vector<24x32xf32>
    %cst_46 = arith.constant 0.000000e+00 : f32
    %163 = vector.broadcast %cst_46 : f32 to vector<24x32xf32>
    %164 = arith.cmpf oge, %162, %163 : vector<24x32xf32>
    %cst_47 = arith.constant 1.000000e-01 : f32
    %165 = vector.broadcast %cst_47 : f32 to vector<24x32xf32>
    %166 = arith.mulf %165, %162 : vector<24x32xf32>
    %167 = arith.select %164, %162, %166 : vector<24x32xi1>, vector<24x32xf32>
    %c0_48 = arith.constant 0 : index
    %c0_49 = arith.constant 0 : index
    %168 = vector.load %arg20[%c0_48, %c0_49] : memref<32x16xf32, #tpu.memory_space<vmem>>, vector<32x16xf32>
    %cst_50 = arith.constant dense<0.000000e+00> : vector<24x16xf32>
    %169 = tpu.matmul %167, %168, %cst_50 {dimension_numbers = #tpu.dot_dimension_numbers<[1], [0], [0], [1], [0, 0, 1, 1], [], []>} : vector<24x32xf32>, vector<32x16xf32>, vector<24x16xf32> -> vector<24x16xf32>
    %cst_51 = arith.constant 0.000000e+00 : f32
    %170 = vector.broadcast %cst_51 : f32 to vector<24x7xf32>
    %cst_52 = arith.constant 0.000000e+00 : f32
    %171 = vector.broadcast %cst_52 : f32 to vector<24x7xf32>
    %172 = tpu.concatenate %170, %169, %171 in 1 : vector<24x7xf32>, vector<24x16xf32>, vector<24x7xf32> -> vector<24x30xf32>
    %173 = vector.extract_strided_slice %172 {offsets = [0, 0], sizes = [24, 16], strides = [1, 1]} : vector<24x30xf32> to vector<24x16xf32>
    %174 = vector.extract_strided_slice %172 {offsets = [0, 1], sizes = [24, 16], strides = [1, 1]} : vector<24x30xf32> to vector<24x16xf32>
    %175 = vector.extract_strided_slice %172 {offsets = [0, 2], sizes = [24, 16], strides = [1, 1]} : vector<24x30xf32> to vector<24x16xf32>
    %176 = vector.extract_strided_slice %172 {offsets = [0, 3], sizes = [24, 16], strides = [1, 1]} : vector<24x30xf32> to vector<24x16xf32>
    %177 = vector.extract_strided_slice %172 {offsets = [0, 4], sizes = [24, 16], strides = [1, 1]} : vector<24x30xf32> to vector<24x16xf32>
    %178 = vector.extract_strided_slice %172 {offsets = [0, 5], sizes = [24, 16], strides = [1, 1]} : vector<24x30xf32> to vector<24x16xf32>
    %179 = vector.extract_strided_slice %172 {offsets = [0, 6], sizes = [24, 16], strides = [1, 1]} : vector<24x30xf32> to vector<24x16xf32>
    %180 = vector.extract_strided_slice %172 {offsets = [0, 7], sizes = [24, 16], strides = [1, 1]} : vector<24x30xf32> to vector<24x16xf32>
    %181 = vector.extract_strided_slice %172 {offsets = [0, 8], sizes = [24, 16], strides = [1, 1]} : vector<24x30xf32> to vector<24x16xf32>
    %182 = vector.extract_strided_slice %172 {offsets = [0, 9], sizes = [24, 16], strides = [1, 1]} : vector<24x30xf32> to vector<24x16xf32>
    %183 = vector.extract_strided_slice %172 {offsets = [0, 10], sizes = [24, 16], strides = [1, 1]} : vector<24x30xf32> to vector<24x16xf32>
    %184 = vector.extract_strided_slice %172 {offsets = [0, 11], sizes = [24, 16], strides = [1, 1]} : vector<24x30xf32> to vector<24x16xf32>
    %185 = vector.extract_strided_slice %172 {offsets = [0, 12], sizes = [24, 16], strides = [1, 1]} : vector<24x30xf32> to vector<24x16xf32>
    %186 = vector.extract_strided_slice %172 {offsets = [0, 13], sizes = [24, 16], strides = [1, 1]} : vector<24x30xf32> to vector<24x16xf32>
    %187 = vector.extract_strided_slice %172 {offsets = [0, 14], sizes = [24, 16], strides = [1, 1]} : vector<24x30xf32> to vector<24x16xf32>
    %188 = tpu.concatenate %173, %174, %175, %176, %177, %178, %179, %180, %181, %182, %183, %184, %185, %186, %187 in 0 : vector<24x16xf32>, vector<24x16xf32>, vector<24x16xf32>, vector<24x16xf32>, vector<24x16xf32>, vector<24x16xf32>, vector<24x16xf32>, vector<24x16xf32>, vector<24x16xf32>, vector<24x16xf32>, vector<24x16xf32>, vector<24x16xf32>, vector<24x16xf32>, vector<24x16xf32>, vector<24x16xf32> -> vector<360x16xf32>
    %c0_53 = arith.constant 0 : index
    %c0_54 = arith.constant 0 : index
    %189 = vector.load %arg8[%c0_53, %c0_54] : memref<24x360xbf16, #tpu.memory_space<vmem>>, vector<24x360xbf16>
    %190 = arith.truncf %188 : vector<360x16xf32> to vector<360x16xbf16>
    %cst_55 = arith.constant dense<0.000000e+00> : vector<24x16xf32>
    %191 = tpu.matmul %189, %190, %cst_55 {dimension_numbers = #tpu.dot_dimension_numbers<[1], [0], [0], [1], [0, 0, 1, 1], [], []>} : vector<24x360xbf16>, vector<360x16xbf16>, vector<24x16xf32> -> vector<24x16xf32>
    %c0_56 = arith.constant 0 : index
    %c0_57 = arith.constant 0 : index
    %192 = vector.load %arg9[%c0_56, %c0_57] : memref<24x1xf32, #tpu.memory_space<vmem>>, vector<24x1xf32>
    %193 = vector.broadcast %192 : vector<24x1xf32> to vector<24x16xf32>
    %194 = arith.addf %191, %193 : vector<24x16xf32>
    %cst_58 = arith.constant 0.000000e+00 : f32
    %195 = vector.broadcast %cst_58 : f32 to vector<24x16xf32>
    %196 = arith.cmpf oge, %194, %195 : vector<24x16xf32>
    %cst_59 = arith.constant 1.000000e-01 : f32
    %197 = vector.broadcast %cst_59 : f32 to vector<24x16xf32>
    %198 = arith.mulf %197, %194 : vector<24x16xf32>
    %199 = arith.select %196, %194, %198 : vector<24x16xi1>, vector<24x16xf32>
    %c0_60 = arith.constant 0 : index
    %c0_61 = arith.constant 0 : index
    %200 = vector.load %arg21[%c0_60, %c0_61] : memref<16x32xf32, #tpu.memory_space<vmem>>, vector<16x32xf32>
    %cst_62 = arith.constant dense<0.000000e+00> : vector<24x32xf32>
    %201 = tpu.matmul %199, %200, %cst_62 {dimension_numbers = #tpu.dot_dimension_numbers<[1], [0], [0], [1], [0, 0, 1, 1], [], []>} : vector<24x16xf32>, vector<16x32xf32>, vector<24x32xf32> -> vector<24x32xf32>
    %202 = tpu.concatenate %201, %167 in 0 : vector<24x32xf32>, vector<24x32xf32> -> vector<48x32xf32>
    %cst_63 = arith.constant 0.000000e+00 : f32
    %203 = vector.broadcast %cst_63 : f32 to vector<48x2xf32>
    %cst_64 = arith.constant 0.000000e+00 : f32
    %204 = vector.broadcast %cst_64 : f32 to vector<48x2xf32>
    %205 = tpu.concatenate %203, %202, %204 in 1 : vector<48x2xf32>, vector<48x32xf32>, vector<48x2xf32> -> vector<48x36xf32>
    %206 = vector.extract_strided_slice %205 {offsets = [0, 0], sizes = [48, 32], strides = [1, 1]} : vector<48x36xf32> to vector<48x32xf32>
    %207 = vector.extract_strided_slice %205 {offsets = [0, 1], sizes = [48, 32], strides = [1, 1]} : vector<48x36xf32> to vector<48x32xf32>
    %208 = vector.extract_strided_slice %205 {offsets = [0, 2], sizes = [48, 32], strides = [1, 1]} : vector<48x36xf32> to vector<48x32xf32>
    %209 = vector.extract_strided_slice %205 {offsets = [0, 3], sizes = [48, 32], strides = [1, 1]} : vector<48x36xf32> to vector<48x32xf32>
    %210 = vector.extract_strided_slice %205 {offsets = [0, 4], sizes = [48, 32], strides = [1, 1]} : vector<48x36xf32> to vector<48x32xf32>
    %211 = tpu.concatenate %206, %207, %208, %209, %210 in 0 : vector<48x32xf32>, vector<48x32xf32>, vector<48x32xf32>, vector<48x32xf32>, vector<48x32xf32> -> vector<240x32xf32>
    %c0_65 = arith.constant 0 : index
    %c0_66 = arith.constant 0 : index
    %212 = vector.load %arg10[%c0_65, %c0_66] : memref<24x240xbf16, #tpu.memory_space<vmem>>, vector<24x240xbf16>
    %213 = arith.truncf %211 : vector<240x32xf32> to vector<240x32xbf16>
    %cst_67 = arith.constant dense<0.000000e+00> : vector<24x32xf32>
    %214 = tpu.matmul %212, %213, %cst_67 {dimension_numbers = #tpu.dot_dimension_numbers<[1], [0], [0], [1], [0, 0, 1, 1], [], []>} : vector<24x240xbf16>, vector<240x32xbf16>, vector<24x32xf32> -> vector<24x32xf32>
    %c0_68 = arith.constant 0 : index
    %c0_69 = arith.constant 0 : index
    %215 = vector.load %arg11[%c0_68, %c0_69] : memref<24x1xf32, #tpu.memory_space<vmem>>, vector<24x1xf32>
    %216 = vector.broadcast %215 : vector<24x1xf32> to vector<24x32xf32>
    %217 = arith.addf %214, %216 : vector<24x32xf32>
    %cst_70 = arith.constant 0.000000e+00 : f32
    %218 = vector.broadcast %cst_70 : f32 to vector<24x32xf32>
    %219 = arith.cmpf oge, %217, %218 : vector<24x32xf32>
    %cst_71 = arith.constant 1.000000e-01 : f32
    %220 = vector.broadcast %cst_71 : f32 to vector<24x32xf32>
    %221 = arith.mulf %220, %217 : vector<24x32xf32>
    %222 = arith.select %219, %217, %221 : vector<24x32xi1>, vector<24x32xf32>
    %c0_72 = arith.constant 0 : index
    %c0_73 = arith.constant 0 : index
    %223 = vector.load %arg22[%c0_72, %c0_73] : memref<32x64xf32, #tpu.memory_space<vmem>>, vector<32x64xf32>
    %cst_74 = arith.constant dense<0.000000e+00> : vector<24x64xf32>
    %224 = tpu.matmul %222, %223, %cst_74 {dimension_numbers = #tpu.dot_dimension_numbers<[1], [0], [0], [1], [0, 0, 1, 1], [], []>} : vector<24x32xf32>, vector<32x64xf32>, vector<24x64xf32> -> vector<24x64xf32>
    %225 = tpu.concatenate %224, %135 in 0 : vector<24x64xf32>, vector<16x64xf32> -> vector<40x64xf32>
    %cst_75 = arith.constant 0.000000e+00 : f32
    %226 = vector.broadcast %cst_75 : f32 to vector<40x2xf32>
    %cst_76 = arith.constant 0.000000e+00 : f32
    %227 = vector.broadcast %cst_76 : f32 to vector<40x2xf32>
    %228 = tpu.concatenate %226, %225, %227 in 1 : vector<40x2xf32>, vector<40x64xf32>, vector<40x2xf32> -> vector<40x68xf32>
    %229 = vector.extract_strided_slice %228 {offsets = [0, 0], sizes = [40, 64], strides = [1, 1]} : vector<40x68xf32> to vector<40x64xf32>
    %230 = vector.extract_strided_slice %228 {offsets = [0, 1], sizes = [40, 64], strides = [1, 1]} : vector<40x68xf32> to vector<40x64xf32>
    %231 = vector.extract_strided_slice %228 {offsets = [0, 2], sizes = [40, 64], strides = [1, 1]} : vector<40x68xf32> to vector<40x64xf32>
    %232 = vector.extract_strided_slice %228 {offsets = [0, 3], sizes = [40, 64], strides = [1, 1]} : vector<40x68xf32> to vector<40x64xf32>
    %233 = vector.extract_strided_slice %228 {offsets = [0, 4], sizes = [40, 64], strides = [1, 1]} : vector<40x68xf32> to vector<40x64xf32>
    %234 = tpu.concatenate %229, %230, %231, %232, %233 in 0 : vector<40x64xf32>, vector<40x64xf32>, vector<40x64xf32>, vector<40x64xf32>, vector<40x64xf32> -> vector<200x64xf32>
    %c0_77 = arith.constant 0 : index
    %c0_78 = arith.constant 0 : index
    %235 = vector.load %arg12[%c0_77, %c0_78] : memref<16x200xbf16, #tpu.memory_space<vmem>>, vector<16x200xbf16>
    %236 = arith.truncf %234 : vector<200x64xf32> to vector<200x64xbf16>
    %cst_79 = arith.constant dense<0.000000e+00> : vector<16x64xf32>
    %237 = tpu.matmul %235, %236, %cst_79 {dimension_numbers = #tpu.dot_dimension_numbers<[1], [0], [0], [1], [0, 0, 1, 1], [], []>} : vector<16x200xbf16>, vector<200x64xbf16>, vector<16x64xf32> -> vector<16x64xf32>
    %c0_80 = arith.constant 0 : index
    %c0_81 = arith.constant 0 : index
    %238 = vector.load %arg13[%c0_80, %c0_81] : memref<16x1xf32, #tpu.memory_space<vmem>>, vector<16x1xf32>
    %239 = vector.broadcast %238 : vector<16x1xf32> to vector<16x64xf32>
    %240 = arith.addf %237, %239 : vector<16x64xf32>
    %cst_82 = arith.constant 0.000000e+00 : f32
    %241 = vector.broadcast %cst_82 : f32 to vector<16x64xf32>
    %242 = arith.cmpf oge, %240, %241 : vector<16x64xf32>
    %cst_83 = arith.constant 1.000000e-01 : f32
    %243 = vector.broadcast %cst_83 : f32 to vector<16x64xf32>
    %244 = arith.mulf %243, %240 : vector<16x64xf32>
    %245 = arith.select %242, %240, %244 : vector<16x64xi1>, vector<16x64xf32>
    %c0_84 = arith.constant 0 : index
    %c0_85 = arith.constant 0 : index
    %246 = vector.load %arg23[%c0_84, %c0_85] : memref<64x128xf32, #tpu.memory_space<vmem>>, vector<64x128xf32>
    %cst_86 = arith.constant dense<0.000000e+00> : vector<16x128xf32>
    %247 = tpu.matmul %245, %246, %cst_86 {dimension_numbers = #tpu.dot_dimension_numbers<[1], [0], [0], [1], [0, 0, 1, 1], [], []>} : vector<16x64xf32>, vector<64x128xf32>, vector<16x128xf32> -> vector<16x128xf32>
    %248 = tpu.concatenate %247, %103 in 0 : vector<16x128xf32>, vector<8x128xf32> -> vector<24x128xf32>
    %cst_87 = arith.constant 0.000000e+00 : f32
    %249 = vector.broadcast %cst_87 : f32 to vector<24x2xf32>
    %cst_88 = arith.constant 0.000000e+00 : f32
    %250 = vector.broadcast %cst_88 : f32 to vector<24x2xf32>
    %251 = tpu.concatenate %249, %248, %250 in 1 : vector<24x2xf32>, vector<24x128xf32>, vector<24x2xf32> -> vector<24x132xf32>
    %252 = vector.extract_strided_slice %251 {offsets = [0, 0], sizes = [24, 128], strides = [1, 1]} : vector<24x132xf32> to vector<24x128xf32>
    %253 = vector.extract_strided_slice %251 {offsets = [0, 1], sizes = [24, 128], strides = [1, 1]} : vector<24x132xf32> to vector<24x128xf32>
    %254 = vector.extract_strided_slice %251 {offsets = [0, 2], sizes = [24, 128], strides = [1, 1]} : vector<24x132xf32> to vector<24x128xf32>
    %255 = vector.extract_strided_slice %251 {offsets = [0, 3], sizes = [24, 128], strides = [1, 1]} : vector<24x132xf32> to vector<24x128xf32>
    %256 = vector.extract_strided_slice %251 {offsets = [0, 4], sizes = [24, 128], strides = [1, 1]} : vector<24x132xf32> to vector<24x128xf32>
    %257 = tpu.concatenate %252, %253, %254, %255, %256 in 0 : vector<24x128xf32>, vector<24x128xf32>, vector<24x128xf32>, vector<24x128xf32>, vector<24x128xf32> -> vector<120x128xf32>
    %c0_89 = arith.constant 0 : index
    %c0_90 = arith.constant 0 : index
    %258 = vector.load %arg14[%c0_89, %c0_90] : memref<8x120xbf16, #tpu.memory_space<vmem>>, vector<8x120xbf16>
    %259 = arith.truncf %257 : vector<120x128xf32> to vector<120x128xbf16>
    %cst_91 = arith.constant dense<0.000000e+00> : vector<8x128xf32>
    %260 = tpu.matmul %258, %259, %cst_91 {dimension_numbers = #tpu.dot_dimension_numbers<[1], [0], [0], [1], [0, 0, 1, 1], [], []>} : vector<8x120xbf16>, vector<120x128xbf16>, vector<8x128xf32> -> vector<8x128xf32>
    %c0_92 = arith.constant 0 : index
    %c0_93 = arith.constant 0 : index
    %261 = vector.load %arg15[%c0_92, %c0_93] : memref<8x1xf32, #tpu.memory_space<vmem>>, vector<8x1xf32>
    %262 = vector.broadcast %261 : vector<8x1xf32> to vector<8x128xf32>
    %263 = arith.addf %260, %262 : vector<8x128xf32>
    %cst_94 = arith.constant 0.000000e+00 : f32
    %264 = vector.broadcast %cst_94 : f32 to vector<8x128xf32>
    %265 = arith.cmpf oge, %263, %264 : vector<8x128xf32>
    %cst_95 = arith.constant 1.000000e-01 : f32
    %266 = vector.broadcast %cst_95 : f32 to vector<8x128xf32>
    %267 = arith.mulf %266, %263 : vector<8x128xf32>
    %268 = arith.select %265, %263, %267 : vector<8x128xi1>, vector<8x128xf32>
    %269 = tpu.concatenate %268, %1 in 0 : vector<8x128xf32>, vector<1x128xf32> -> vector<9x128xf32>
    %c0_96 = arith.constant 0 : index
    %c0_97 = arith.constant 0 : index
    %270 = vector.load %arg16[%c0_96, %c0_97] : memref<9x1xf32, #tpu.memory_space<vmem>>, vector<9x1xf32>
    %271 = vector.broadcast %270 : vector<9x1xf32> to vector<9x128xf32>
    %272 = arith.mulf %271, %269 : vector<9x128xf32>
    %cst_98 = arith.constant dense<0.000000e+00> : vector<128xf32>
    %273 = vector.multi_reduction <add>, %272, %cst_98 [0] : vector<9x128xf32> to vector<128xf32>
    %274 = vector.shape_cast %273 : vector<128xf32> to vector<1x128xf32>
    %c0_99 = arith.constant 0 : index
    %c0_100 = arith.constant 0 : index
    %275 = vector.load %arg17[%c0_99, %c0_100] : memref<1x1xf32, #tpu.memory_space<vmem>>, vector<1x1xf32>
    %276 = vector.broadcast %275 : vector<1x1xf32> to vector<1x128xf32>
    %277 = arith.addf %274, %276 : vector<1x128xf32>
    %278 = math.tanh %277 : vector<1x128xf32>
    %c0_101 = arith.constant 0 : index
    %c0_102 = arith.constant 0 : index
    %c0_103 = arith.constant 0 : index
    %279 = vector.load %arg24[%c0_101, %c0_102, %c0_103] : memref<1x1x128xf32, #tpu.memory_space<vmem>>, vector<1x1x128xf32>
    %280 = vector.shape_cast %279 : vector<1x1x128xf32> to vector<1x128xf32>
    %281 = vector.shape_cast %278 : vector<1x128xf32> to vector<1x1x128xf32>
    tpu.vector_store %arg24[%c0_101, %c0_102, %c0_103], %281 {strides = array<i32>} : memref<1x1x128xf32, #tpu.memory_space<vmem>>, vector<1x1x128xf32>,
    return
  }
  func.func @transform_0(%arg0: i32) -> (i32, i32, i32) {
    %c0_i32 = arith.constant 0 : i32
    %c0_i32_0 = arith.constant 0 : i32
    %c0_i32_1 = arith.constant 0 : i32
    return %arg0, %c0_i32, %c0_i32_0 : i32, i32, i32
  }
  func.func @transform_1(%arg0: i32) -> (i32, i32) {
    %c0_i32 = arith.constant 0 : i32
    %c0_i32_0 = arith.constant 0 : i32
    %c0_i32_1 = arith.constant 0 : i32
    return %c0_i32, %c0_i32_0 : i32, i32
  }
  func.func @transform_2(%arg0: i32) -> (i32, i32) {
    %c0_i32 = arith.constant 0 : i32
    %c0_i32_0 = arith.constant 0 : i32
    %c0_i32_1 = arith.constant 0 : i32
    return %c0_i32, %c0_i32_0 : i32, i32
  }
  func.func @transform_3(%arg0: i32) -> (i32, i32) {
    %c0_i32 = arith.constant 0 : i32
    %c0_i32_0 = arith.constant 0 : i32
    %c0_i32_1 = arith.constant 0 : i32
    return %c0_i32, %c0_i32_0 : i32, i32
  }
  func.func @transform_4(%arg0: i32) -> (i32, i32) {
    %c0_i32 = arith.constant 0 : i32
    %c0_i32_0 = arith.constant 0 : i32
    %c0_i32_1 = arith.constant 0 : i32
    return %c0_i32, %c0_i32_0 : i32, i32
  }
  func.func @transform_5(%arg0: i32) -> (i32, i32) {
    %c0_i32 = arith.constant 0 : i32
    %c0_i32_0 = arith.constant 0 : i32
    %c0_i32_1 = arith.constant 0 : i32
    return %c0_i32, %c0_i32_0 : i32, i32
  }
  func.func @transform_6(%arg0: i32) -> (i32, i32) {
    %c0_i32 = arith.constant 0 : i32
    %c0_i32_0 = arith.constant 0 : i32
    %c0_i32_1 = arith.constant 0 : i32
    return %c0_i32, %c0_i32_0 : i32, i32
  }
  func.func @transform_7(%arg0: i32) -> (i32, i32) {
    %c0_i32 = arith.constant 0 : i32
    %c0_i32_0 = arith.constant 0 : i32
    %c0_i32_1 = arith.constant 0 : i32
    return %c0_i32, %c0_i32_0 : i32, i32
  }
  func.func @transform_8(%arg0: i32) -> (i32, i32) {
    %c0_i32 = arith.constant 0 : i32
    %c0_i32_0 = arith.constant 0 : i32
    %c0_i32_1 = arith.constant 0 : i32
    return %c0_i32, %c0_i32_0 : i32, i32
  }
  func.func @transform_9(%arg0: i32) -> (i32, i32) {
    %c0_i32 = arith.constant 0 : i32
    %c0_i32_0 = arith.constant 0 : i32
    %c0_i32_1 = arith.constant 0 : i32
    return %c0_i32, %c0_i32_0 : i32, i32
  }
  func.func @transform_10(%arg0: i32) -> (i32, i32) {
    %c0_i32 = arith.constant 0 : i32
    %c0_i32_0 = arith.constant 0 : i32
    %c0_i32_1 = arith.constant 0 : i32
    return %c0_i32, %c0_i32_0 : i32, i32
  }
  func.func @transform_11(%arg0: i32) -> (i32, i32) {
    %c0_i32 = arith.constant 0 : i32
    %c0_i32_0 = arith.constant 0 : i32
    %c0_i32_1 = arith.constant 0 : i32
    return %c0_i32, %c0_i32_0 : i32, i32
  }
  func.func @transform_12(%arg0: i32) -> (i32, i32) {
    %c0_i32 = arith.constant 0 : i32
    %c0_i32_0 = arith.constant 0 : i32
    %c0_i32_1 = arith.constant 0 : i32
    return %c0_i32, %c0_i32_0 : i32, i32
  }
  func.func @transform_13(%arg0: i32) -> (i32, i32) {
    %c0_i32 = arith.constant 0 : i32
    %c0_i32_0 = arith.constant 0 : i32
    %c0_i32_1 = arith.constant 0 : i32
    return %c0_i32, %c0_i32_0 : i32, i32
  }
  func.func @transform_14(%arg0: i32) -> (i32, i32) {
    %c0_i32 = arith.constant 0 : i32
    %c0_i32_0 = arith.constant 0 : i32
    %c0_i32_1 = arith.constant 0 : i32
    return %c0_i32, %c0_i32_0 : i32, i32
  }
  func.func @transform_15(%arg0: i32) -> (i32, i32) {
    %c0_i32 = arith.constant 0 : i32
    %c0_i32_0 = arith.constant 0 : i32
    %c0_i32_1 = arith.constant 0 : i32
    return %c0_i32, %c0_i32_0 : i32, i32
  }
  func.func @transform_16(%arg0: i32) -> (i32, i32) {
    %c0_i32 = arith.constant 0 : i32
    %c0_i32_0 = arith.constant 0 : i32
    %c0_i32_1 = arith.constant 0 : i32
    return %c0_i32, %c0_i32_0 : i32, i32
  }
  func.func @transform_17(%arg0: i32) -> (i32, i32) {
    %c0_i32 = arith.constant 0 : i32
    %c0_i32_0 = arith.constant 0 : i32
    %c0_i32_1 = arith.constant 0 : i32
    return %c0_i32, %c0_i32_0 : i32, i32
  }
  func.func @transform_18(%arg0: i32) -> (i32, i32) {
    %c0_i32 = arith.constant 0 : i32
    %c0_i32_0 = arith.constant 0 : i32
    %c0_i32_1 = arith.constant 0 : i32
    return %c0_i32, %c0_i32_0 : i32, i32
  }
  func.func @transform_19(%arg0: i32) -> (i32, i32) {
    %c0_i32 = arith.constant 0 : i32
    %c0_i32_0 = arith.constant 0 : i32
    %c0_i32_1 = arith.constant 0 : i32
    return %c0_i32, %c0_i32_0 : i32, i32
  }
  func.func @transform_20(%arg0: i32) -> (i32, i32) {
    %c0_i32 = arith.constant 0 : i32
    %c0_i32_0 = arith.constant 0 : i32
    %c0_i32_1 = arith.constant 0 : i32
    return %c0_i32, %c0_i32_0 : i32, i32
  }
  func.func @transform_21(%arg0: i32) -> (i32, i32) {
    %c0_i32 = arith.constant 0 : i32
    %c0_i32_0 = arith.constant 0 : i32
    %c0_i32_1 = arith.constant 0 : i32
    return %c0_i32, %c0_i32_0 : i32, i32
  }
  func.func @transform_22(%arg0: i32) -> (i32, i32) {
    %c0_i32 = arith.constant 0 : i32
    %c0_i32_0 = arith.constant 0 : i32
    %c0_i32_1 = arith.constant 0 : i32
    return %c0_i32, %c0_i32_0 : i32, i32
  }
  func.func @transform_23(%arg0: i32) -> (i32, i32, i32) {
    %c0_i32 = arith.constant 0 : i32
    %c0_i32_0 = arith.constant 0 : i32
    %c0_i32_1 = arith.constant 0 : i32
    return %arg0, %c0_i32, %c0_i32_0 : i32, i32, i32
  }
}

</mosaic_0001>

<bundles_post_ra>
// kernel: unet_forward.1
= control target key start
LH: loop header
LB: loop body
LE: loop exit
PB: predicated region body
PF: predicated region fallthrough
CT: control target
= control target key end

     0   :  { %s3922_s0 = inlined_call_operand.vmem [shape: f32[2,1,128], index: 0, kind: input, shape index: {}]   ;;  %s3923_s1 = inlined_call_operand.vmem [shape: f32[8,15], index: 1, kind: input, shape index: {}]   ;;  %s3924_s2 = inlined_call_operand.vmem [shape: f32[8,1], index: 2, kind: input, shape index: {}]   ;;  %s3925_s3 = inlined_call_operand.vmem [shape: bf16[16,120], index: 3, kind: input, shape index: {}]   ;;  %s3926_s4 = inlined_call_operand.vmem [shape: f32[16,1], index: 4, kind: input, shape index: {}]   ;;  %s3927_s5 = inlined_call_operand.vmem [shape: bf16[24,240], index: 5, kind: input, shape index: {}]   ;;  %s3928_s6 = inlined_call_operand.vmem [shape: f32[24,1], index: 6, kind: input, shape index: {}]   ;;  %s3929_s7 = inlined_call_operand.vmem [shape: bf16[24,360], index: 7, kind: input, shape index: {}]   ;;  %s3930_s8 = inlined_call_operand.vmem [shape: f32[24,1], index: 8, kind: input, shape index: {}]   ;;  %s3931_s9 = inlined_call_operand.vmem [shape: bf16[24,240], index: 9, kind: input, shape index: {}]   ;;  %s3932_s10 = inlined_call_operand.vmem [shape: f32[24,1], index: 10, kind: input, shape index: {}]   ;;  %s3933_s11 = inlined_call_operand.vmem [shape: bf16[16,200], index: 11, kind: input, shape index: {}]   ;;  %s3934_s12 = inlined_call_operand.vmem [shape: f32[16,1], index: 12, kind: input, shape index: {}]   ;;  %s3935_s13 = inlined_call_operand.vmem [shape: bf16[8,120], index: 13, kind: input, shape index: {}]   ;;  %s3936_s14 = inlined_call_operand.vmem [shape: f32[8,1], index: 14, kind: input, shape index: {}]   ;;  %s3937_s15 = inlined_call_operand.vmem [shape: f32[9,1], index: 15, kind: input, shape index: {}]   ;;  %s3938_s16 = inlined_call_operand.<no memory space> [shape: f32[1,1], index: 16, kind: input, shape index: {}]   ;;  %s3939_s17 = inlined_call_operand.vmem [shape: f32[128,64], index: 17, kind: input, shape index: {}]   ;;  %s3940_s18 = inlined_call_operand.vmem [shape: f32[64,32], index: 18, kind: input, shape index: {}]   ;;  %s3941_s19 = inlined_call_operand.vmem [shape: f32[32,16], index: 19, kind: input, shape index: {}]   ;;  %s3942_s20 = inlined_call_operand.vmem [shape: f32[16,32], index: 20, kind: input, shape index: {}]   ;;  %s3943_s21 = inlined_call_operand.vmem [shape: f32[32,64], index: 21, kind: input, shape index: {}]   ;;  %s3944_s22 = inlined_call_operand.vmem [shape: f32[64,128], index: 22, kind: input, shape index: {}]   ;;  %s3945_s23 = inlined_call_operand.hbm [shape: f32[2,1,128], index: 23, kind: output, shape index: {}]  }
   0x1   :  { %3998 = sst [smem:[#allocation16_spill]] %s3922_s0  ;;  %v28_v0 = vstv %s3938_s16 }
   0x2   :  { %3999 = sst [smem:[#allocation17_spill]] %s3923_s1  ;;  %29 = vst [vmem:[#allocation2] sm:$0x1] %v28_v0 }
   0x3   :  { %4000 = sst [smem:[#allocation18_spill]] %s3924_s2 }
   0x4   :  { %4001 = sst [smem:[#allocation19_spill]] %s3925_s3 }
   0x5   :  { %4002 = sst [smem:[#allocation20_spill]] %s3926_s4 }
   0x6   :  { %4003 = sst [smem:[#allocation21_spill]] %s3927_s5 }
   0x7   :  { %4004 = sst [smem:[#allocation22_spill]] %s3928_s6 }
   0x8   :  { %4005 = sst [smem:[#allocation23_spill]] %s3929_s7 }
   0x9   :  { %4006 = sst [smem:[#allocation24_spill]] %s3931_s9 }
   0xa   :  { %4007 = sst [smem:[#allocation25_spill]] %s3933_s11 }
   0xb   :  { %4008 = sst [smem:[#allocation26_spill]] %s3934_s12 }
   0xc   :  { %4009 = sst [smem:[#allocation27_spill]] %s3935_s13 }
   0xd   :  { %4010 = sst [smem:[#allocation28_spill]] %s3936_s14 }
   0xe   :  { %4011 = sst [smem:[#allocation29_spill]] %s3937_s15 }
   0xf   :  { %4012 = sst [smem:[#allocation30_spill]] %s3939_s17 }
  0x10   :  { %4013 = sst [smem:[#allocation31_spill]] %s3944_s22 }
  0x11   :  { %4014 = sst [smem:[#allocation32_spill]] %s3945_s23 }
  0x12   :  { %30 = vsyncpa [#allocation4], 0 }
  0x13   :  { %32 = vsyncpa [#allocation4 + $0x1], 0  ;;  %s3169_s24 = smov 0   ;;  %s3171_s25 = smov 0  }
  0x14   :  { %s3173_s5 = smov 0   ;;  %s3175_s1 = smov 0  }
  0x15 LB: > { %4015 = sst [smem:[#allocation6_spill]] %s3000_s24  ;;  %s3190_s16 = sadd.s32 4294967295, %s3012_s1   ;;  %s3012_s1 = sphi %s3175_s1, %s4070_s1   ;;  %s3008_s5 = sphi %s3173_s5, %s4073_s5   ;;  %s3004_s25 = sphi %s3171_s25, %s4072_s25   ;;  %s3000_s24 = sphi %s3169_s24, %s4071_s24  }
  0x16   : > { %4016 = sst [smem:[#allocation7_spill]] %s3004_s25  ;;  %s2402_s26 = sadd.s32 4294967294, %s3012_s1  }
  0x17   : > { %4017 = sst [smem:[#allocation8_spill]] %s3008_s5  ;;  %s3194_s2 = sadd.s32 1, %s3012_s1  }
  0x18   : > { %4018 = sst [smem:[#allocation9_spill]] %s3012_s1  ;;  %s533_s6 = sadd.s32 1, %s3008_s5 }
  0x19   : > { %4019 = sst [smem:[#allocation10_spill]] %s3190_s16  ;;  %s530_s27 = ssub.s32 %s3012_s1, %s3194_s2 }
  0x1a   : > { %4020 = sst [smem:[#allocation11_spill]] %s3194_s2  ;;  %p543_p0 = scmp.ne.s32.totalorder %s3008_s5, %s3004_s25 }
  0x1b   : > { %p531_p1 = scmp.eq.s32.totalorder %s530_s27, 0  ;;  %p544_p2 = scmp.eq.s32.totalorder %s3190_s16, 1 }
  0x1c   : > { %p549_p3 = scmp.ne.s32.totalorder %s3004_s25, %s3000_s24  ;;  %p550_p4 = scmp.eq.s32.totalorder %s2402_s26, 1 }
  0x1d   : > { %s3205_s7 = scalar_select %p531_p1, %s3008_s5, %s533_s6  }
  0x1e   : > { %p3207_p5 = por %p544_p2, %p543_p0  ;;  %p3211_p6 = por %p550_p4, %p549_p3 }
  0x1f   : > { %4021 = sst [smem:[#allocation12_spill]] %s3205_s7  ;;  %p2405_p7 = scmp.ge.s32.totalorder %s3012_s1, 1 }
  0x20   : > { %s4022_s28 = scalar_select %p3207_p5, 1, 0 }
  0x21   : > { %s4024_s29 = scalar_select %p3211_p6, 1, 0 }
  0x22   : > { %4023 = sst [smem:[#allocation13_spill]] %s4022_s28  ;;  %p640_p8 = scmp.lt.s32.totalorder %s3012_s1, 3 }
  0x23   : > { %4025 = sst [smem:[#allocation14_spill]] %s4024_s29 }
  0x24   : > { %p641_p9 = pnand %p2405_p7, %p640_p8 }
  0x26   : > { %644 = sbr.rel (%p641_p9) target bundleno = 3691 (0xe6b), region = 112 }
  0x2b   : > { %s4026_s4 = sld [smem:[#allocation17_spill]]  ;;  %p701_p10 = scmp.lt.s32.totalorder %s3190_s16, 1  ;;  %v3014_v2 = vmov 4   ;;  %v3015_v3 = vmov 2   ;;  %v3016_v4 = vmov 1   ;;  %v3018_v6 = vmov 5  }
  0x2c   : > { %2593 = vset.pattern.permute.xlu2 %v3014_v2  ;;  %2591 = vset.pattern.permute.xlu1 %v3015_v3  ;;  %s4027_s27 = sld [smem:[#allocation16_spill]]  ;;  %s3978_s3 = smov 7   ;;  %v3019_v7 = vmov 3   ;;  %v3020_v8 = vmov 7   ;;  %v3021_v9 = vmov 6   ;;  %v3022_v10 = vmov 8  }
  0x2d   : > { %s702_s30 = scalar_select %p701_p10, %s3190_s16, 1  ;;  %2590 = vset.pattern.permute.xlu0 %v3016_v4  ;;  %v3023_v11 = vmov 10   ;;  %v3024_v12 = vmov 9   ;;  %v3025_v13 = vmov 13   ;;  %v3026_v14 = vmov 12  }
  0x2e   : > { %v3027_v15 = vmov 11   ;;  %v3028_v16 = vmov 0   ;;  %v3029_v17 = vmov 14   ;;  %vm711_vm0 = vcmask 56320   ;;  %s3958_s26 = smov 126   ;;  %s3952_s6 = smov 127  }
  0x2f   : > { %s3956_s0 = smov 123   ;;  %s4030_s17 = sld [smem:[#allocation30_spill]]  ;;  %vm743_vm1 = vcmask 1039360   ;;  %vm759_vm2 = vcmask 1031168   ;;  %vm775_vm3 = vcmask 1022976   ;;  %vm791_vm4 = vcmask 1014784  }
  0x30   : > { %vm807_vm5 = vcmask 1006592   ;;  %vm823_vm6 = vcmask 998400   ;;  %vm839_vm7 = vcmask 990208   ;;  %vm855_vm8 = vcmask 982016   ;;  %s4037_s5 = smov 118   ;;  %s4040_s2 = smov 119  }
  0x31   : > { %v721_v1 = vld [vmem:[%s4026_s4] sm:$0xff]  ;;  %s3954_s4 = smov 124   ;;  %vm871_vm9 = vcmask 973824   ;;  %vm887_vm10 = vcmask 965632   ;;  %vm903_vm11 = vcmask 957440   ;;  %vm919_vm12 = vcmask 949248  }
  0x32   : > { %780 = vperm.xlu2 %2593, %v721_v1   ;;  %748 = vperm.xlu1 %2591, %v721_v1   ;;  %s3225_s7 = scalar_lea.vmem %s4027_s27, %s702_s30  ;;  %s4029_s30 = sld [smem:[#allocation18_spill]]  ;;  %vm935_vm13 = vcmask 941056   ;;  %vm951_vm14 = vcmask 932864  }
  0x33   : > { %4028 = sst [smem:[#allocation15_spill]] %s3225_s7  ;;  %v2947_v5 = vld [vmem:[%s3225_s7] ss:$0 sm:$0xff]  ;;  %s3950_s27 = smov 125  }
  0x34   : > { %708 = vrot.lane.b32.xlu0 %v2947_v5, %s3978_s3  ;;  %s4038_s3 = smov 121   ;;  %s4041_s29 = smov 126  }
  0x35   : > { %s4042_s24 = smov 123   ;;  %s4043_s1 = smov 124  }
  0x36   : > { %s4044_s23 = smov 127   ;;  %s4045_s28 = smov 125  }
  0x37   : > { %s4046_s13 = sld [smem:[#allocation20_spill]] }
  0x38   : > { %v714_v18 = vld [vmem:[%s4029_s30] sm:$0xff]  ;;  %s3962_s30 = smov 122   ;;  %s4047_s12 = sld [smem:[#allocation19_spill]] }
  0x39   : > { %s4049_s9 = sld [smem:[#allocation21_spill]] }
  0x3a   : > { %2594 = vset.pattern.permute.xlu2 %v3018_v6  ;;  %2592 = vset.pattern.permute.xlu1 %v3019_v7  ;;  %s4057_s7 = sld [smem:[#allocation31_spill]] }
  0x3b   : > { %796 = vperm.xlu2 %2594, %v721_v1   ;;  %764 = vperm.xlu1 %2592, %v721_v1   ;;  %s4060_s22 = sld [smem:[#allocation28_spill]] }
  0x3c   : > { %731 = vperm.xlu0 %2590, %v721_v1   ;;  %s4062_s14 = sld [smem:[#allocation27_spill]] }
  0x3d   : > { %s4063_s25 = sld [smem:[#allocation7_spill]] }
  0x3e   : > { %s4064_s11 = sld [smem:[#allocation10_spill]] }
  0x43   : > { %2596 = vset.pattern.permute.xlu2 %v3020_v8  ;;  %2595 = vset.pattern.permute.xlu1 %v3021_v9 }
  0x44   : > { %828 = vperm.xlu2 %2596, %v721_v1   ;;  %812 = vperm.xlu1 %2595, %v721_v1  }
  0x45   : > { %2597 = vset.pattern.permute.xlu0 %v3022_v10 }
  0x46   : > { %844 = vperm.xlu0 %2597, %v721_v1  }
  0x4c   : > { %2599 = vset.pattern.permute.xlu2 %v3023_v11  ;;  %2598 = vset.pattern.permute.xlu1 %v3024_v12  ;;  %v973_v12 = vld [vmem:[%s4030_s17 + $0x78] sm:$0xff] }
  0x4d   : > { %876 = vperm.xlu2 %2599, %v721_v1   ;;  %860 = vperm.xlu1 %2598, %v721_v1  }
  0x4e   : > { %2602 = vset.pattern.permute.xlu0 %v3025_v13  ;;  %974 = vmatpush.msra.mxu0 %v973_v12 }
  0x4f   : > { %924 = vperm.xlu0 %2602, %v721_v1  }
  0x55   : > { %2601 = vset.pattern.permute.xlu2 %v3026_v14  ;;  %2600 = vset.pattern.permute.xlu1 %v3027_v15  ;;  %v972_v14 = vld [vmem:[%s4030_s17 + $0x70] sm:$0xff]  ;;  %v971_v15 = vld [vmem:[%s4030_s17 + $0x68] sm:$0xff] }
  0x56   : > { %908 = vperm.xlu2 %2601, %v721_v1   ;;  %892 = vperm.xlu1 %2600, %v721_v1  }
  0x57   : > { %2606 = vset.pattern.permute.xlu0 %v3028_v16  ;;  %975 = vmatpush.msra.mxu0 %v972_v14 }
  0x59   : > { %976 = vmatpush.msra.mxu0 %v971_v15 }
  0x5e   : > { %2603 = vset.pattern.permute.xlu1 %v3029_v17  ;;  %2604 = vset.pattern.permute.xlu2 %v3028_v16 }
  0x5f   : > { %940 = vperm.xlu1 %2603, %v721_v1   ;;  %724 = vperm.xlu2 %2604, %v721_v1  }
  0x67   : > { %2605 = vset.pattern.permute.xlu1 %v3028_v16  ;;  %v970_v16 = vld [vmem:[%s4030_s17 + $0x60] sm:$0xff] }
  0x68   : > { %717 = vperm.xlu1 %2605, %v714_v18   ;;  %977 = vmatpush.msra.mxu0 %v970_v16 }
  0x8c   : > { %v781_v27 = vpop.permute.xlu2 %780 }
  0x95   : > { %v797_v34 = vpop.permute.xlu2 %796 }
  0x9e   : > { %v829_v44 = vpop.permute.xlu2 %828 }
  0xa4   : > { %v749_v19 = vpop.permute.xlu1 %748 }
  0xa6   : > { %v709_v20 = vpop.permute.xlu0 %708 }
  0xa7   : > { %v712_v21 = vsel %vm711_vm0, 0.0, %v709_v20  ;;  %v713_v23 = vsel %vm711_vm0, %v709_v20, 0.0  ;;  %v877_v49 = vpop.permute.xlu2 %876 }
  0xa8   : > { %v3233_v22 = vperm.slane %v712_v21, 0  ;;  %v3238_v25 = vperm.slane %v713_v23, 0  ;;  %v968_v21 = vld [vmem:[%s4030_s17 + $0x50] sm:$0xff]  ;;  %v967_v23 = vld [vmem:[%s4030_s17 + $0x48] sm:$0xff] }
  0xaa   : > { %v751_v24 = vmul.f32 %v749_v19, %v3233_v22  ;;  %v752_v33 = vmul.f32 %v749_v19, %v3238_v25  ;;  %v799_v35 = vmul.f32 %v797_v34, %v3233_v22  ;;  %v784_v37 = vmul.f32 %v781_v27, %v3238_v25  ;;  %v969_v19 = vld [vmem:[%s4030_s17 + $0x58] sm:$0xff] }
  0xab   : > { %v783_v38 = vmul.f32 %v781_v27, %v3233_v22  ;;  %v800_v42 = vmul.f32 %v797_v34, %v3238_v25  ;;  %v832_v46 = vmul.f32 %v829_v44, %v3238_v25  ;;  %v831_v47 = vmul.f32 %v829_v44, %v3233_v22  ;;  %978 = vmatpush.msra.mxu0 %v969_v19  ;;  %v965_v27 = vld [vmem:[%s4030_s17 + $0x38] sm:$0xff] }
  0xac   : > { %755 = vrot.lane.b32.xlu1 %v751_v24, %s3958_s26  ;;  %v880_v55 = vmul.f32 %v877_v49, %v3238_v25  ;;  %v879_v56 = vmul.f32 %v877_v49, %v3233_v22  ;;  %v966_v24 = vld [vmem:[%s4030_s17 + $0x40] sm:$0xff] }
  0xad   : > { %v765_v28 = vpop.permute.xlu1 %764  ;;  %979 = vmatpush.msra.mxu0 %v968_v21 }
  0xae   : > { %v732_v26 = vpop.permute.xlu0 %731  ;;  %v768_v31 = vmul.f32 %v765_v28, %v3238_v25  ;;  %v767_v32 = vmul.f32 %v765_v28, %v3233_v22 }
  0xaf   : > { %v735_v29 = vmul.f32 %v732_v26, %v3233_v22  ;;  %v736_v30 = vmul.f32 %v3238_v25, %v732_v26  ;;  %980 = vmatpush.msra.mxu0 %v967_v23 }
  0xb0   : > { %v909_v54 = vpop.permute.xlu2 %908 }
  0xb1   : > { %741 = vrot.lane.b32.xlu0 %v736_v30, %s3952_s6  ;;  %739 = vrot.lane.b32.xlu2 %v735_v29, %s3952_s6  ;;  %s3964_s6 = smov 121   ;;  %v912_v57 = vmul.f32 %v909_v54, %v3238_v25  ;;  %v911_v58 = vmul.f32 %v909_v54, %v3233_v22  ;;  %v964_v29 = vld [vmem:[%s4030_s17 + $0x30] sm:$0xff]  ;;  %v963_v30 = vld [vmem:[%s4030_s17 + $0x28] sm:$0xff] }
  0xb2   : > { %981 = vmatpush.msra.mxu0 %v966_v24 }
  0xb4   : > { %773 = vrot.lane.b32.xlu1 %v768_v31, %s3950_s27  ;;  %982 = vmatpush.msra.mxu0 %v965_v27 }
  0xb6   : > { %v813_v36 = vpop.permute.xlu1 %812  ;;  %983 = vmatpush.msra.mxu0 %v964_v29 }
  0xb7   : > { %v816_v39 = vmul.f32 %v813_v36, %v3238_v25  ;;  %v815_v40 = vmul.f32 %v813_v36, %v3233_v22 }
  0xb8   : > { %v845_v41 = vpop.permute.xlu0 %844  ;;  %984 = vmatpush.msra.mxu0 %v963_v30 }
  0xb9   : > { %771 = vrot.lane.b32.xlu0 %v767_v32, %s3950_s27  ;;  %757 = vrot.lane.b32.xlu2 %v752_v33, %s3958_s26  ;;  %v847_v43 = vmul.f32 %v845_v41, %v3233_v22  ;;  %s3970_s27 = smov 120   ;;  %v848_v50 = vmul.f32 %v845_v41, %v3238_v25  ;;  %s3966_s26 = smov 118   ;;  %v725_v2 = vpop.permute.xlu2 %724  ;;  %v962_v32 = vld [vmem:[%s4030_s17 + $0x20] sm:$0xff] }
  0xba   : > { %v728_v31 = vmul.f32 %v3233_v22, %v725_v2  ;;  %985 = vmatpush.msra.mxu0 %v962_v32  ;;  %v1054_v32 = vld [vmem:[%s4046_s13] sm:$0xff] }
  0xbc   : > { %803 = vrot.lane.b32.xlu1 %v799_v35, %s3956_s0 }
  0xbf   : > { %v861_v45 = vpop.permute.xlu1 %860 }
  0xc0   : > { %v864_v48 = vmul.f32 %v861_v45, %v3238_v25  ;;  %v863_v51 = vmul.f32 %v861_v45, %v3233_v22  ;;  %v958_v45 = vld [vmem:[%s4030_s17] sm:$0xff] }
  0xc1   : > { %789 = vrot.lane.b32.xlu0 %v784_v37, %s3954_s4  ;;  %787 = vrot.lane.b32.xlu2 %v783_v38, %s3954_s4  ;;  %s3960_s4 = smov 119   ;;  %v925_v62 = vpop.permute.xlu0 %924  ;;  %v961_v38 = vld [vmem:[%s4030_s17 + $0x18] sm:$0xff] }
  0xc2   : > { %v927_v63 = vmul.f32 %v925_v62, %v3233_v22  ;;  %v928_v0 = vmul.f32 %v925_v62, %v3238_v25  ;;  %986 = vmatpush.msra.mxu0 %v961_v38 }
  0xc4   : > { %821 = vrot.lane.b32.xlu1 %v816_v39, %s3962_s30  ;;  %v960_v39 = vld [vmem:[%s4030_s17 + $0x10] sm:$0xff] }
  0xc5   : > { %987 = vmatpush.msra.mxu0 %v960_v39 }
  0xc8   : > { %v893_v52 = vpop.permute.xlu1 %892 }
  0xc9   : > { %819 = vrot.lane.b32.xlu0 %v815_v40, %s3962_s30  ;;  %805 = vrot.lane.b32.xlu2 %v800_v42, %s3956_s0  ;;  %v895_v53 = vmul.f32 %v893_v52, %v3233_v22  ;;  %s3968_s0 = smov 117   ;;  %v896_v59 = vmul.f32 %v893_v52, %v3238_v25  ;;  %s3974_s30 = smov 114   ;;  %v959_v42 = vld [vmem:[%s4030_s17 + $0x8] sm:$0xff] }
  0xca   : > { %988 = vmatpush.msra.mxu0 %v959_v42  ;;  %s4039_s17 = smov 122  }
  0xcc   : > { %851 = vrot.lane.b32.xlu1 %v847_v43, %s3970_s27  ;;  %989 = vmatpush.msra.mxu0 %v958_v45 }
  0xd1   : > { %837 = vrot.lane.b32.xlu0 %v832_v46, %s3964_s6  ;;  %835 = vrot.lane.b32.xlu2 %v831_v47, %s3964_s6  ;;  %v941_v60 = vpop.permute.xlu1 %940  ;;  %s3976_s6 = smov 115  }
  0xd2   : > { %v943_v61 = vmul.f32 %v941_v60, %v3233_v22  ;;  %v944_v1 = vmul.f32 %v941_v60, %v3238_v25 }
  0xd4   : > { %869 = vrot.lane.b32.xlu1 %v864_v48, %s3960_s4 }
  0xd9   : > { %867 = vrot.lane.b32.xlu0 %v863_v51, %s3960_s4  ;;  %853 = vrot.lane.b32.xlu2 %v848_v50, %s3970_s27  ;;  %s3972_s4 = smov 116   ;;  %s4033_s27 = smov 116  }
  0xda   : > { %v718_v5 = vpop.permute.xlu1 %717 }
  0xdb   : > { %v729_v34 = vadd.f32 %v728_v31, %v718_v5 }
  0xdc   : > { %899 = vrot.lane.b32.xlu1 %v895_v53, %s3968_s0 }
  0xe1   : > { %885 = vrot.lane.b32.xlu0 %v880_v55, %s3966_s26  ;;  %883 = vrot.lane.b32.xlu2 %v879_v56, %s3966_s26  ;;  %s4031_s26 = smov 7  }
  0xe4   : > { %917 = vrot.lane.b32.xlu1 %v912_v57, %s3972_s4 }
  0xe9   : > { %915 = vrot.lane.b32.xlu0 %v911_v58, %s3972_s4  ;;  %901 = vrot.lane.b32.xlu2 %v896_v59, %s3968_s0  ;;  %s4032_s0 = smov 115   ;;  %s4034_s4 = smov 114  }
  0xec   : > { %947 = vrot.lane.b32.xlu1 %v943_v61, %s3974_s30 }
  0xf1   : > { %933 = vrot.lane.b32.xlu0 %v928_v0, %s3976_s6  ;;  %931 = vrot.lane.b32.xlu2 %v927_v63, %s3976_s6  ;;  %s4035_s6 = smov 120  }
  0xf9   : > { %949 = vrot.lane.b32.xlu2 %v944_v1, %s3974_s30  ;;  %s4036_s30 = smov 117  }
 0x10b   : > { %v740_v3 = vpop.permute.xlu2 %739 }
 0x113   : > { %v758_v4 = vpop.permute.xlu2 %757 }
 0x11b   : > { %v788_v7 = vpop.permute.xlu2 %787 }
 0x11e   : > { %v756_v6 = vpop.permute.xlu1 %755 }
 0x11f   : > { %v760_v40 = vsel %vm759_vm2, %v756_v6, %v758_v4 }
 0x123   : > { %v742_v8 = vpop.permute.xlu0 %741  ;;  %v3294_v10 = vpop.permute.xlu2 %805 }
 0x124   : > { %v744_v33 = vsel %vm743_vm1, %v740_v3, %v742_v8 }
 0x125   : > { %v746_v36 = vadd.f32 %v744_v33, %v729_v34  ;;  %v1105_v33 = vld [vmem:[%s3940_s18 + $0x38] sm:$0xff]  ;;  %v1104_v34 = vld [vmem:[%s3940_s18 + $0x30] sm:$0xff] }
 0x126   : > { %v774_v9 = vpop.permute.xlu1 %773  ;;  %1121 = vmatpush.msra.mxu2 %v1105_v33 }
 0x127   : > { %v762_v43 = vadd.f32 %v760_v40, %v746_v36 }
 0x128   : > { %1122 = vmatpush.msra.mxu2 %v1104_v34 }
 0x12b   : > { %v772_v11 = vpop.permute.xlu0 %771  ;;  %v836_v17 = vpop.permute.xlu2 %835 }
 0x12c   : > { %v776_v41 = vsel %vm775_vm3, %v772_v11, %v774_v9 }
 0x12d   : > { %v778_v46 = vadd.f32 %v776_v41, %v762_v43 }
 0x12e   : > { %v804_v13 = vpop.permute.xlu1 %803 }
 0x12f   : > { %v808_v50 = vsel %vm807_vm5, %v804_v13, %v3294_v10  ;;  %vm999_vm5 = vcmask 580608  }
 0x133   : > { %v790_v18 = vpop.permute.xlu0 %789  ;;  %v854_v26 = vpop.permute.xlu2 %853 }
 0x134   : > { %v792_v44 = vsel %vm791_vm4, %v788_v7, %v790_v18 }
 0x135   : > { %v794_v48 = vadd.f32 %v792_v44, %v778_v46 }
 0x136   : > { %v822_v20 = vpop.permute.xlu1 %821 }
 0x137   : > { %v810_v52 = vadd.f32 %v808_v50, %v794_v48  ;;  %v2509_v50 = vld [vmem:[%s4047_s12] sm:$0xff]  ;;  %s4048_s12 = sld [smem:[#allocation22_spill]] }
 0x13b   : > { %v820_v25 = vpop.permute.xlu0 %819  ;;  %v884_v22 = vpop.permute.xlu2 %883 }
 0x13c   : > { %v824_v51 = vsel %vm823_vm6, %v820_v25, %v822_v20  ;;  %v1055_v20 = vld [vmem:[%s4046_s13 + $0x8] sm:$0xff]  ;;  %vm1074_vm6 = vcmask 1043456  }
 0x13d   : > { %v826_v55 = vadd.f32 %v824_v51, %v810_v52  ;;  %v1100_v51 = vld [vmem:[%s3940_s18 + $0x10] sm:$0xff]  ;;  %v1099_v52 = vld [vmem:[%s3940_s18 + $0x8] sm:$0xff] }
 0x13e   : > { %v852_v28 = vpop.permute.xlu1 %851 }
 0x13f   : > { %v856_v58 = vsel %vm855_vm8, %v852_v28, %v854_v26 }
 0x143   : > { %v838_v35 = vpop.permute.xlu0 %837  ;;  %v902_v53 = vpop.permute.xlu2 %901 }
 0x144   : > { %v840_v54 = vsel %vm839_vm7, %v836_v17, %v838_v35  ;;  %v1103_v35 = vld [vmem:[%s3940_s18 + $0x28] sm:$0xff]  ;;  %vm3044_vm7 = vmmov 1  }
 0x145   : > { %v842_v57 = vadd.f32 %v840_v54, %v826_v55  ;;  %1123 = vmatpush.msra.mxu2 %v1103_v35 }
 0x146   : > { %v870_v37 = vpop.permute.xlu1 %869 }
 0x147   : > { %v858_v60 = vadd.f32 %v856_v58, %v842_v57 }
 0x14b   : > { %v868_v47 = vpop.permute.xlu0 %867  ;;  %v932_v63 = vpop.permute.xlu2 %931 }
 0x14c   : > { %v872_v59 = vsel %vm871_vm9, %v868_v47, %v870_v37  ;;  %v1102_v37 = vld [vmem:[%s3940_s18 + $0x20] sm:$0xff]  ;;  %vm2410_vm9 = vmpackc.low %vm3044_vm7, %vm999_vm5 }
 0x14d   : > { %v874_v0 = vadd.f32 %v872_v59, %v858_v60  ;;  %1124 = vmatpush.msra.mxu2 %v1102_v37 }
 0x14e   : > { %v900_v49 = vpop.permute.xlu1 %899 }
 0x14f   : > { %v904_v3 = vsel %vm903_vm11, %v900_v49, %v902_v53  ;;  %v1098_v53 = vld [vmem:[%s3940_s18] sm:$0xff]  ;;  %vm1106_vm11 = vcmask 523264  }
 0x153   : > { %v886_v56 = vpop.permute.xlu0 %885  ;;  %v950_v10 = vpop.permute.xlu2 %949 }
 0x154   : > { %v888_v62 = vsel %vm887_vm10, %v884_v22, %v886_v56  ;;  %v1101_v22 = vld [vmem:[%s3940_s18 + $0x18] sm:$0xff] }
 0x155   : > { %v890_v2 = vadd.f32 %v888_v62, %v874_v0  ;;  %1125 = vmatpush.msra.mxu2 %v1101_v22 }
 0x156   : > { %v918_v61 = vpop.permute.xlu1 %917 }
 0x157   : > { %v906_v5 = vadd.f32 %v904_v3, %v890_v2  ;;  %1126 = vmatpush.msra.mxu2 %v1100_v51 }
 0x159   : > { %1127 = vmatpush.msra.mxu2 %v1099_v52 }
 0x15b   : > { %v916_v1 = vpop.permute.xlu0 %915  ;;  %1128 = vmatpush.msra.mxu2 %v1098_v53 }
 0x15c   : > { %v920_v4 = vsel %vm919_vm12, %v916_v1, %v918_v61 }
 0x15d   : > { %v922_v6 = vadd.f32 %v920_v4, %v906_v5 }
 0x15e   : > { %v948_v7 = vpop.permute.xlu1 %947 }
 0x15f   : > { %v952_v12 = vsel %vm951_vm14, %v948_v7, %v950_v10 }
 0x163   : > { %v934_v8 = vpop.permute.xlu0 %933 }
 0x164   : > { %v936_v9 = vsel %vm935_vm13, %v932_v63, %v934_v8  ;;  %vm1146_vm13 = vcmask 318464  }
 0x165   : > { %v938_v11 = vadd.f32 %v936_v9, %v922_v6  ;;  %vm2424_vm14 = vmpackc.low %vm1146_vm13, %vm1146_vm13 }
 0x167   : > { %v954_v13 = vadd.f32 %v952_v12, %v938_v11  ;;  %v1253_v12 = vld [vmem:[%s4048_s12] sm:$0xff] }
 0x169   : > { %vm955_vm15 = vcmp.ge.f32.partialorder %v954_v13, 0.0  ;;  %v956_v14 = vmul.f32 0.1, %v954_v13 }
 0x16b   : > { %v3351_v15 = vsel %vm955_vm15, %v954_v13, %v956_v14  ;;  %v1255_v13 = vld [vmem:[%s4048_s12 + $0x10] sm:$0xff]  ;;  %v1254_v14 = vld [vmem:[%s4048_s12 + $0x8] sm:$0xff]  ;;  %vm1286_vm15 = vcmask 916480  }
 0x16c   : > { %990 = vmatmul.f32.vlgmr.msra.gmra.mxu0 %v3351_v15 }
 0x1e9   : > { %v991_v16 = vpop.f32.mrf.mxu0 }
 0x1ea   : > { %995 = vrot.lane.b32.xlu0 %v991_v16, %s4031_s26 }
 0x25c   : > { %v996_v17 = vpop.permute.xlu0 %995 }
 0x25d   : > { %v3356_v18 = vsel %vm711_vm0, 0.0, %v996_v17 }
 0x25e   : > { %v1000_v19 = vsel %vm999_vm5, %v3356_v18, 0.0 }
 0x25f   : > { %1038 = vrot.lane.b32.xlu0 %v1000_v19, %s4032_s0  ;;  %1035 = vrot.lane.b32.xlu2 %v1000_v19, %s4033_s27 }
 0x260   : > { %1041 = vrot.lane.b32.xlu1 %v1000_v19, %s4034_s4 }
 0x267   : > { %1023 = vrot.lane.b32.xlu0 %v1000_v19, %s4035_s6  ;;  %1032 = vrot.lane.b32.xlu2 %v1000_v19, %s4036_s30 }
 0x268   : > { %1029 = vrot.lane.b32.xlu1 %v1000_v19, %s4037_s5 }
 0x26f   : > { %1020 = vrot.lane.b32.xlu0 %v1000_v19, %s4038_s3  ;;  %1017 = vrot.lane.b32.xlu2 %v1000_v19, %s4039_s17 }
 0x270   : > { %1026 = vrot.lane.b32.xlu1 %v1000_v19, %s4040_s2 }
 0x277   : > { %1005 = vrot.lane.b32.xlu0 %v1000_v19, %s4041_s29  ;;  %1014 = vrot.lane.b32.xlu2 %v1000_v19, %s4042_s24 }
 0x278   : > { %1011 = vrot.lane.b32.xlu1 %v1000_v19, %s4043_s1 }
 0x27f   : > { %1002 = vrot.lane.b32.xlu2 %v1000_v19, %s4044_s23  ;;  %1058 = vperm.xlu0 %2606, %v1054_v32  }
 0x280   : > { %1008 = vrot.lane.b32.xlu1 %v1000_v19, %s4045_s28 }
 0x288   : > { %1063 = vperm.xlu1 %2605, %v1055_v20  }
 0x2b9   : > { %v1036_v21 = vpop.permute.xlu2 %1035 }
 0x2c1   : > { %v1033_v27 = vpop.permute.xlu2 %1032 }
 0x2c9   : > { %v1018_v36 = vpop.permute.xlu2 %1017 }
 0x2d1   : > { %v1039_v23 = vpop.permute.xlu0 %1038  ;;  %v1015_v42 = vpop.permute.xlu2 %1014 }
 0x2d2   : > { %v1042_v24 = vpop.permute.xlu1 %1041  ;;  %v1052_v28 = vpack.c.bf16 %v1039_v23, %v1036_v21 }
 0x2d3   : > { %v1053_v25 = vpack.c.bf16 %v1042_v24, %v1042_v24 }
 0x2d5   : > { %v1076_v26 = vsel %vm1074_vm6, %v1053_v25, 0 }
 0x2d6   : > { %1078 = vmatpush.bf16.msra.mxu1 %v1076_v26 }
 0x2d9   : > { %v1024_v29 = vpop.permute.xlu0 %1023  ;;  %v1003_v48 = vpop.permute.xlu2 %1002 }
 0x2da   : > { %1079 = vmatpush.bf16.msra.mxu1 %v1052_v28  ;;  %v1030_v30 = vpop.permute.xlu1 %1029  ;;  %v2411_v49 = vpack.c.bf16 %v1003_v48, %v3356_v18 }
 0x2db   : > { %v1051_v31 = vpack.c.bf16 %v1033_v27, %v1030_v30 }
 0x2de   : > { %1080 = vmatpush.bf16.msra.mxu1 %v1051_v31 }
 0x2e1   : > { %v1021_v40 = vpop.permute.xlu0 %1020 }
 0x2e2   : > { %v1027_v38 = vpop.permute.xlu1 %1026  ;;  %v1049_v41 = vpack.c.bf16 %v1021_v40, %v1018_v36 }
 0x2e3   : > { %v1050_v39 = vpack.c.bf16 %v1027_v38, %v1024_v29 }
 0x2e5   : > { %1081 = vmatpush.bf16.msra.mxu1 %v1050_v39 }
 0x2e9   : > { %1082 = vmatpush.bf16.msra.mxu1 %v1049_v41  ;;  %v1006_v45 = vpop.permute.xlu0 %1005 }
 0x2ea   : > { %v1012_v43 = vpop.permute.xlu1 %1011 }
 0x2eb   : > { %v1048_v44 = vpack.c.bf16 %v1015_v42, %v1012_v43 }
 0x2ed   : > { %1083 = vmatpush.bf16.msra.mxu1 %v1048_v44 }
 0x2f1   : > { %v1059_v54 = vpop.permute.xlu0 %1058 }
 0x2f2   : > { %v1009_v46 = vpop.permute.xlu1 %1008 }
 0x2f3   : > { %v1047_v47 = vpack.c.bf16 %v1009_v46, %v1006_v45 }
 0x2f5   : > { %1084 = vmatpush.bf16.msra.mxu1 %v1047_v47 }
 0x2f9   : > { %2412 = vmatpush.bf16.msk.msra.mxu1 %vm2410_vm9, %v2411_v49  ;;  %vm1342_vm9 = vcmask 261120  }
 0x2fa   : > { %v1064_v59 = vpop.permute.xlu1 %1063 }
 0x2fc   : > { %2413 = vmatmul.msk.bf16.vlgmr.msra.gmra.mxu1 %vm855_vm8, %v2509_v50 }
 0x379   : > { %v1087_v55 = vpop.f32.mrf.mxu1 }
 0x37a   : > { %v1088_v56 = vadd.f32 %v1087_v55, %v1059_v54 }
 0x37c   : > { %v1094_v57 = vmul.f32 0.1, %v1088_v56  ;;  %vm1092_vm10 = vcmp.ge.f32.partialorder %v1088_v56, 0.0 }
 0x37e   : > { %v3412_v58 = vsel %vm1092_vm10, %v1088_v56, %v1094_v57 }
 0x37f   : > { %2414 = vmatmul.msk.f32.vlgmr.msra.gmra.mxu2 %vm1106_vm11, %v3412_v58 }
 0x381   : > { %v1089_v60 = vpop.f32.mrf.mxu1 }
 0x382   : > { %v1090_v61 = vadd.f32 %v1089_v60, %v1064_v59 }
 0x384   : > { %v1095_v62 = vmul.f32 0.1, %v1090_v61  ;;  %vm1093_vm12 = vcmp.ge.f32.partialorder %v1090_v61, 0.0 }
 0x386   : > { %v3416_v63 = vsel %vm1093_vm12, %v1090_v61, %v1095_v62 }
 0x387   : > { %2415 = vmatmul.msk.f32.gmra.mxu2 %vm1106_vm11, %v3416_v63 }
 0x402   : > { %v1130_v0 = vpop.f32.mrf.mxu2 }
 0x40a   : > { %v1133_v1 = vpop.f32.mrf.mxu2 }
 0x40b   : > { %v2607_v2 = vpack.i.bf16 %v1133_v1, %v1130_v0 }
 0x40d   : > { %2608 = vrot.lane.b32.xlu2 %v2607_v2, %s4031_s26 }
 0x467   : > { %v2609_v3 = vpop.permute.xlu2 %2608 }
 0x468   : > { %v2611_v4 = vunpack.i.h.bf16 %v2609_v3  ;;  %v2610_v5 = vunpack.i.l.bf16 %v2609_v3 }
 0x46a   : > { %v3422_v6 = vsel %vm711_vm0, 0.0, %v2611_v4  ;;  %v3425_v7 = vsel %vm711_vm0, 0.0, %v2610_v5 }
 0x46b   : > { %v1148_v8 = vsel %vm1146_vm13, %v3422_v6, 0.0  ;;  %v1147_v9 = vsel %vm1146_vm13, %v3425_v7, 0.0  ;;  %v2425_v10 = vpack.c.bf16 %v3422_v6, %v3425_v7  ;;  %v1237_v6 = vld [vmem:[%s4049_s9 + $0x10] sm:$0xff]  ;;  %vm1393_vm13 = vcmask 187392  }
 0x46c   : > { %v2622_v11 = vpack.i.bf16 %v1148_v8, %v1147_v9  ;;  %v2418_v8 = vld [vmem:[%s4049_s9] sm:$0xf]  ;;  %v2511_v9 = vld [vmem:[%s4049_s9 + $0x4] sm:$0xf0]  ;;  %v1278_v7 = vunpack.c.l.b16 %v1237_v6 }
 0x46e   : > { %2623 = vrot.lane.b32.xlu0 %v2622_v11, %s4034_s4  ;;  %2618 = vrot.lane.b32.xlu2 %v2622_v11, %s4039_s17 }
 0x46f   : > { %2613 = vrot.lane.b32.xlu1 %v2622_v11, %s4038_s3 }
 0x476   : > { %2638 = vrot.lane.b32.xlu0 %v2622_v11, %s4043_s1  ;;  %2633 = vrot.lane.b32.xlu2 %v2622_v11, %s4032_s0 }
 0x477   : > { %2628 = vrot.lane.b32.xlu1 %v2622_v11, %s4042_s24 }
 0x47e   : > { %2653 = vrot.lane.b32.xlu0 %v2622_v11, %s4036_s30  ;;  %2648 = vrot.lane.b32.xlu2 %v2622_v11, %s4045_s28 }
 0x47f   : > { %2643 = vrot.lane.b32.xlu1 %v2622_v11, %s4033_s27 }
 0x486   : > { %2668 = vrot.lane.b32.xlu0 %v2622_v11, %s4044_s23  ;;  %2663 = vrot.lane.b32.xlu2 %v2622_v11, %s4037_s5 }
 0x487   : > { %2658 = vrot.lane.b32.xlu1 %v2622_v11, %s4041_s29 }
 0x48e   : > { %1258 = vperm.xlu0 %2606, %v1253_v12   ;;  %2678 = vrot.lane.b32.xlu2 %v2622_v11, %s4035_s6 }
 0x48f   : > { %2673 = vrot.lane.b32.xlu1 %v2622_v11, %s4040_s2 }
 0x496   : > { %1268 = vperm.xlu2 %2604, %v1255_v13  }
 0x497   : > { %1263 = vperm.xlu1 %2605, %v1254_v14   ;;  %v2419_v14 = vor.u32 %v2511_v9, %v2418_v8  ;;  %v1555_v8 = vld [vmem:[%s3930_s8] sm:$0xff]  ;;  %v1556_v9 = vld [vmem:[%s3930_s8 + $0x8] sm:$0xff] }
 0x4c8   : > { %v2619_v16 = vpop.permute.xlu2 %2618 }
 0x4c9   : > { %v2621_v28 = vunpack.i.h.bf16 %v2619_v16  ;;  %v2620_v29 = vunpack.i.l.bf16 %v2619_v16  ;;  %v2510_v16 = vld [vmem:[%s4049_s9 + $0x4] sm:$0xf] }
 0x4cb   : > { %v1244_v33 = vpack.c.bf16 %v2621_v28, %v2620_v29 }
 0x4d0   : > { %v2634_v17 = vpop.permute.xlu2 %2633 }
 0x4d1   : > { %v2636_v25 = vunpack.i.h.bf16 %v2634_v17  ;;  %v2635_v26 = vunpack.i.l.bf16 %v2634_v17  ;;  %v2420_v17 = vld [vmem:[%s4049_s9 + $0x8] sm:$0xf0]  ;;  %s4056_s9 = sld [smem:[#allocation25_spill]] }
 0x4d3   : > { %v1251_v31 = vpack.c.bf16 %v2636_v25, %v2635_v26  ;;  %v1339_v25 = vld [vmem:[%s3941_s19 + $0x8] sm:$0xff]  ;;  %v1338_v26 = vld [vmem:[%s3941_s19] sm:$0xff] }
 0x4d8   : > { %v2649_v37 = vpop.permute.xlu2 %2648 }
 0x4d9   : > { %v2651_v40 = vunpack.i.h.bf16 %v2649_v37  ;;  %v2650_v41 = vunpack.i.l.bf16 %v2649_v37 }
 0x4db   : > { %v1241_v49 = vpack.c.bf16 %v2651_v40, %v2650_v41 }
 0x4e0   : > { %v2624_v18 = vpop.permute.xlu0 %2623  ;;  %v2664_v51 = vpop.permute.xlu2 %2663 }
 0x4e1   : > { %v2626_v19 = vunpack.i.h.bf16 %v2624_v18  ;;  %v2625_v20 = vunpack.i.l.bf16 %v2624_v18  ;;  %v2614_v21 = vpop.permute.xlu1 %2613  ;;  %v2666_v52 = vunpack.i.h.bf16 %v2664_v51  ;;  %v2665_v53 = vunpack.i.l.bf16 %v2664_v51 }
 0x4e2   : > { %v2616_v23 = vunpack.i.h.bf16 %v2614_v21  ;;  %v2615_v24 = vunpack.i.l.bf16 %v2614_v21 }
 0x4e3   : > { %v1252_v27 = vpack.c.bf16 %v2626_v19, %v2625_v20  ;;  %v1248_v0 = vpack.c.bf16 %v2666_v52, %v2665_v53  ;;  %v2423_v19 = vor.u32 %v2510_v16, %v2420_v17  ;;  %v1282_v20 = vpack.c.b16 %v1278_v7, %v1278_v7 }
 0x4e4   : > { %v1245_v30 = vpack.c.bf16 %v2616_v23, %v2615_v24  ;;  %v1341_v23 = vld [vmem:[%s3941_s19 + $0x18] sm:$0xff]  ;;  %v1340_v24 = vld [vmem:[%s3941_s19 + $0x10] sm:$0xff] }
 0x4e5   : > { %1312 = vmatpush.bf16.msrb.mxu2 %v1252_v27  ;;  %1364 = vmatpush.msrb.mxu0 %v1341_v23 }
 0x4e6   : > { %1293 = vmatpush.bf16.msra.mxu3 %v1245_v30 }
 0x4e7   : > { %1365 = vmatpush.msrb.mxu0 %v1340_v24 }
 0x4e8   : > { %v2639_v32 = vpop.permute.xlu0 %2638  ;;  %v2679_v2 = vpop.permute.xlu2 %2678 }
 0x4e9   : > { %v2629_v34 = vpop.permute.xlu1 %2628  ;;  %1313 = vmatpush.bf16.msrb.mxu2 %v1251_v31  ;;  %v2641_v38 = vunpack.i.h.bf16 %v2639_v32  ;;  %v2640_v22 = vunpack.i.l.bf16 %v2639_v32  ;;  %v2681_v11 = vunpack.i.h.bf16 %v2679_v2  ;;  %v2680_v12 = vunpack.i.l.bf16 %v2679_v2  ;;  %1366 = vmatpush.msrb.mxu0 %v1339_v25 }
 0x4ea   : > { %v2631_v35 = vunpack.i.h.bf16 %v2629_v34  ;;  %v2630_v36 = vunpack.i.l.bf16 %v2629_v34  ;;  %1294 = vmatpush.bf16.msra.mxu3 %v1244_v33 }
 0x4eb   : > { %v1242_v43 = vpack.c.bf16 %v2641_v38, %v2640_v22  ;;  %v1246_v18 = vpack.c.bf16 %v2681_v11, %v2680_v12  ;;  %1367 = vmatpush.msrb.mxu0 %v1338_v26  ;;  %v1557_v11 = vld [vmem:[%s3930_s8 + $0x10] sm:$0xff] }
 0x4ec   : > { %v1243_v39 = vpack.c.bf16 %v2631_v35, %v2630_v36 }
 0x4ee   : > { %1295 = vmatpush.bf16.msra.mxu3 %v1243_v39 }
 0x4f0   : > { %v2654_v42 = vpop.permute.xlu0 %2653  ;;  %v1269_v41 = vpop.permute.xlu2 %1268 }
 0x4f1   : > { %v2644_v44 = vpop.permute.xlu1 %2643  ;;  %v2656_v47 = vunpack.i.h.bf16 %v2654_v42  ;;  %v2655_v48 = vunpack.i.l.bf16 %v2654_v42 }
 0x4f2   : > { %v2646_v45 = vunpack.i.h.bf16 %v2644_v44  ;;  %v2645_v46 = vunpack.i.l.bf16 %v2644_v44  ;;  %1296 = vmatpush.bf16.msra.mxu3 %v1242_v43 }
 0x4f3   : > { %v1249_v54 = vpack.c.bf16 %v2656_v47, %v2655_v48 }
 0x4f4   : > { %v1250_v50 = vpack.c.bf16 %v2646_v45, %v2645_v46 }
 0x4f6   : > { %1297 = vmatpush.bf16.msra.mxu3 %v1241_v49  ;;  %1314 = vmatpush.bf16.msrb.mxu2 %v1250_v50 }
 0x4f8   : > { %v2669_v55 = vpop.permute.xlu0 %2668 }
 0x4f9   : > { %v2659_v56 = vpop.permute.xlu1 %2658  ;;  %v2671_v60 = vunpack.i.h.bf16 %v2669_v55  ;;  %v2670_v61 = vunpack.i.l.bf16 %v2669_v55 }
 0x4fa   : > { %v2661_v57 = vunpack.i.h.bf16 %v2659_v56  ;;  %v2660_v59 = vunpack.i.l.bf16 %v2659_v56  ;;  %1315 = vmatpush.bf16.msrb.mxu2 %v1249_v54 }
 0x4fb   : > { %v1239_v1 = vpack.c.bf16 %v2671_v60, %v2670_v61 }
 0x4fc   : > { %v1240_v62 = vpack.c.bf16 %v2661_v57, %v2660_v59 }
 0x4fe   : > { %1298 = vmatpush.bf16.msra.mxu3 %v1240_v62  ;;  %1316 = vmatpush.bf16.msrb.mxu2 %v1248_v0 }
 0x500   : > { %v1259_v28 = vpop.permute.xlu0 %1258 }
 0x501   : > { %v2674_v3 = vpop.permute.xlu1 %2673 }
 0x502   : > { %v2676_v4 = vunpack.i.h.bf16 %v2674_v3  ;;  %v2675_v5 = vunpack.i.l.bf16 %v2674_v3  ;;  %1299 = vmatpush.bf16.msra.mxu3 %v1239_v1 }
 0x504   : > { %v1247_v13 = vpack.c.bf16 %v2676_v4, %v2675_v5 }
 0x506   : > { %2426 = vmatpush.bf16.msk.msra.mxu3 %vm2424_vm14, %v2425_v10  ;;  %1317 = vmatpush.bf16.msrb.mxu2 %v1247_v13  ;;  %v1279_v10 = vunpack.c.h.b16 %v1237_v6  ;;  %vm2447_vm14 = vmpackc.low %vm1393_vm13, %vm1393_vm13 }
 0x508   : > { %v1283_v21 = vpack.c.b16 %v1279_v10, %v1279_v10 }
 0x509   : > { %1301 = vmatmul.bf16.vlgmr.msra.gmra.mxu3 %v2419_v14  ;;  %v1264_v35 = vpop.permute.xlu1 %1263 }
 0x50a   : > { %1318 = vmatpush.bf16.msrb.mxu2 %v1246_v18 }
 0x50d   : > { %2427 = vmatmul.msk.bf16.vlgmr.msrb.gmra.mxu2 %vm1286_vm15, %v2423_v19 }
 0x519   : > { %1306 = vmatmul.bf16.gmra.mxu3 %v1282_v20 }
 0x51d   : > { %2428 = vmatmul.msk.bf16.gmra.mxu2 %vm1286_vm15, %v1283_v21 }
 0x58c   : > { %v1302_v27 = vpop.f32.mrf.mxu3 }
 0x58d   : > { %v1303_v29 = vadd.f32 %v1302_v27, %v1259_v28 }
 0x590   : > { %v1320_v30 = vpop.f32.mrf.mxu2 }
 0x591   : > { %v1321_v31 = vadd.f32 %v1320_v30, %v1303_v29 }
 0x593   : > { %vm1329_vm5 = vcmp.ge.f32.partialorder %v1321_v31, 0.0  ;;  %v1332_v32 = vmul.f32 0.1, %v1321_v31 }
 0x594   : > { %v1304_v33 = vpop.f32.mrf.mxu3 }
 0x595   : > { %v3490_v34 = vsel %vm1329_vm5, %v1321_v31, %v1332_v32  ;;  %v1305_v36 = vadd.f32 %v1304_v33, %v1264_v35  ;;  %vm1598_vm5 = vcmask 850944  }
 0x596   : > { %2429 = vmatmul.msk.f32.vlgmr.msrb.gmra.mxu0 %vm1342_vm9, %v3490_v34 }
 0x598   : > { %v1322_v37 = vpop.f32.mrf.mxu2 }
 0x599   : > { %v1323_v38 = vadd.f32 %v1322_v37, %v1305_v36 }
 0x59b   : > { %v1333_v22 = vmul.f32 0.1, %v1323_v38  ;;  %vm1330_vm10 = vcmp.ge.f32.partialorder %v1323_v38, 0.0 }
 0x59c   : > { %v1307_v39 = vpop.f32.mrf.mxu3 }
 0x59d   : > { %v3494_v40 = vsel %vm1330_vm10, %v1323_v38, %v1333_v22  ;;  %v1308_v42 = vadd.f32 %v1307_v39, %v1269_v41  ;;  %vm1730_vm10 = vcmask 15360  }
 0x59e   : > { %2430 = vmatmul.msk.f32.gmra.mxu0 %vm1342_vm9, %v3494_v40 }
 0x5a0   : > { %v1325_v43 = vpop.f32.mrf.mxu2 }
 0x5a1   : > { %v1326_v44 = vadd.f32 %v1325_v43, %v1308_v42 }
 0x5a3   : > { %v1334_v45 = vmul.f32 0.1, %v1326_v44  ;;  %vm1331_vm12 = vcmp.ge.f32.partialorder %v1326_v44, 0.0 }
 0x5a4   : > { %v1309_v46 = vpop.f32.mrf.mxu3 }
 0x5a5   : > { %v1337_v47 = vsel %vm1331_vm12, %v1326_v44, %v1334_v45  ;;  %vm1737_vm12 = vcmask 277504  }
 0x5a6   : > { %v2762_v48 = vpack.i.bf16 %v1337_v47, %v3494_v40  ;;  %2431 = vmatmul.msk.f32.gmra.mxu0 %vm1342_vm9, %v1337_v47 }
 0x5a8   : > { %v1327_v49 = vpop.f32.mrf.mxu2 }
 0x613   : > { %v1369_v50 = vpop.f32.mrf.mxu0 }
 0x61b   : > { %v1372_v51 = vpop.f32.mrf.mxu0 }
 0x61c   : > { %v2682_v52 = vpack.i.bf16 %v1372_v51, %v1369_v50 }
 0x61e   : > { %2683 = vrot.lane.b32.xlu0 %v2682_v52, %s4031_s26 }
 0x623   : > { %v1375_v53 = vpop.f32.mrf.mxu0 }
 0x624   : > { %1385 = vrot.lane.b32.xlu1 %v1375_v53, %s4031_s26 }
 0x690   : > { %v2684_v54 = vpop.permute.xlu0 %2683 }
 0x691   : > { %v2686_v55 = vunpack.i.h.bf16 %v2684_v54  ;;  %v2685_v56 = vunpack.i.l.bf16 %v2684_v54 }
 0x693   : > { %v3503_v57 = vsel %vm711_vm0, 0.0, %v2686_v55  ;;  %v3506_v59 = vsel %vm711_vm0, 0.0, %v2685_v56 }
 0x694   : > { %v1394_v60 = vsel %vm1393_vm13, %v3506_v59, 0.0  ;;  %v2448_v61 = vpack.c.bf16 %v3503_v57, %v3506_v59  ;;  %v1395_v62 = vsel %vm1393_vm13, %v3503_v57, 0.0  ;;  %v1672_v57 = vld [vmem:[%s3942_s20 + $0x8] sm:$0xff]  ;;  %v1671_v59 = vld [vmem:[%s3942_s20] sm:$0xff] }
 0x695   : > { %1454 = vrot.lane.b32.xlu0 %v1394_v60, %s4038_s3  ;;  %1472 = vrot.lane.b32.xlu2 %v1394_v60, %s4040_s2  ;;  %v2687_v1 = vpack.i.bf16 %v1395_v62, %v1394_v60 }
 0x696   : > { %1436 = vrot.lane.b32.xlu1 %v1394_v60, %s4042_s24  ;;  %v1386_v0 = vpop.permute.xlu1 %1385  ;;  %1697 = vmatpush.msra.mxu2 %v1672_v57 }
 0x697   : > { %v3523_v2 = vsel %vm711_vm0, 0.0, %v1386_v0  ;;  %vm2444_vm0 = vmpackc.low %vm3044_vm7, %vm1393_vm13 }
 0x698   : > { %v1396_v3 = vsel %vm1393_vm13, %v3523_v2, 0.0  ;;  %1698 = vmatpush.msra.mxu2 %v1671_v59 }
 0x699   : > { %v2702_v4 = vpack.i.bf16 %v1394_v60, %v1396_v3  ;;  %v2697_v5 = vpack.i.bf16 %v1396_v3, %v1395_v62 }
 0x69d   : > { %1429 = vrot.lane.b32.xlu0 %v1395_v62, %s4043_s1  ;;  %1508 = vrot.lane.b32.xlu2 %v1394_v60, %s4032_s0 }
 0x69e   : > { %1418 = vrot.lane.b32.xlu1 %v1394_v60, %s4045_s28 }
 0x6a5   : > { %1519 = vrot.lane.b32.xlu0 %v1395_v62, %s4034_s4  ;;  %2688 = vrot.lane.b32.xlu2 %v2687_v1, %s4037_s5 }
 0x6a6   : > { %1411 = vrot.lane.b32.xlu1 %v1395_v62, %s4041_s29 }
 0x6ad   : > { %1447 = vrot.lane.b32.xlu0 %v1395_v62, %s4039_s17  ;;  %1465 = vrot.lane.b32.xlu2 %v1395_v62, %s4035_s6 }
 0x6ae   : > { %2703 = vrot.lane.b32.xlu1 %v2702_v4, %s4035_s6 }
 0x6b5   : > { %2698 = vrot.lane.b32.xlu2 %v2697_v5, %s4040_s2  ;;  %2693 = vrot.lane.b32.xlu0 %v2702_v4, %s4043_s1  ;;  %s699_s2 = sand.u32 1, %s4063_s25  }
 0x6b6   : > { %2713 = vrot.lane.b32.xlu1 %v2697_v5, %s4045_s28 }
 0x6bd   : > { %2723 = vrot.lane.b32.xlu2 %v2697_v5, %s4038_s3  ;;  %2708 = vrot.lane.b32.xlu0 %v2702_v4, %s4034_s4  ;;  %s4066_s4 = sld [smem:[#allocation32_spill]] }
 0x6be   : > { %2733 = vrot.lane.b32.xlu1 %v2697_v5, %s4032_s0  ;;  %s4055_s0 = sld [smem:[#allocation26_spill]] }
 0x6c5   : > { %2728 = vrot.lane.b32.xlu2 %v2702_v4, %s4039_s17  ;;  %2718 = vrot.lane.b32.xlu0 %v2702_v4, %s4041_s29 }
 0x6c6   : > { %2743 = vrot.lane.b32.xlu1 %v2702_v4, %s4033_s27 }
 0x6cd   : > { %2738 = vrot.lane.b32.xlu2 %v2697_v5, %s4044_s23  ;;  %1400 = vrot.lane.b32.xlu0 %v1394_v60, %s4044_s23 }
 0x6ce   : > { %2748 = vrot.lane.b32.xlu1 %v2697_v5, %s4042_s24  ;;  %s4058_s24 = sld [smem:[#allocation29_spill]] }
 0x6d4   : > { %s4059_s6 = smov %s4058_s24 }
 0x6d5   : > { %1501 = vrot.lane.b32.xlu2 %v1395_v62, %s4033_s27  ;;  %2753 = vrot.lane.b32.xlu0 %v2697_v5, %s4036_s30  ;;  %s3045_s27 = smov 2  }
 0x6d6   : > { %1485 = vrot.lane.b32.xlu1 %v1396_v3, %s4037_s5  ;;  %s4050_s5 = sld [smem:[#allocation23_spill]] }
 0x6dc   : > { %s4051_s3 = smov %s4050_s5 }
 0x6dd   : > { %1490 = vrot.lane.b32.xlu2 %v1394_v60, %s4036_s30  ;;  %1560 = vperm.xlu0 %2606, %v1555_v8   ;;  %s4054_s30 = sld [smem:[#allocation24_spill]] }
 0x6de   : > { %1565 = vperm.xlu1 %2605, %v1556_v9  }
 0x6e5   : > { %1570 = vperm.xlu2 %2604, %v1557_v11  }
 0x6e6   : > { %2763 = vrot.lane.b32.xlu1 %v2762_v48, %s3045_s27 }
 0x6ef   : > { %v1473_v12 = vpop.permute.xlu2 %1472 }
 0x6f7   : > { %v3557_v13 = vpop.permute.xlu2 %1508 }
 0x6ff   : > { %v2689_v14 = vpop.permute.xlu2 %2688 }
 0x700   : > { %v2691_v16 = vunpack.i.h.bf16 %v2689_v14  ;;  %v2690_v17 = vunpack.i.l.bf16 %v2689_v14 }
 0x702   : > { %v1547_v18 = vpack.c.bf16 %v2691_v16, %v2690_v17 }
 0x704   : > { %1626 = vmatpush.bf16.msrb.mxu3 %v1547_v18 }
 0x707   : > { %v1455_v19 = vpop.permute.xlu0 %1454  ;;  %v1466_v6 = vpop.permute.xlu2 %1465 }
 0x708   : > { %v1437_v7 = vpop.permute.xlu1 %1436 }
 0x70f   : > { %v1430_v10 = vpop.permute.xlu0 %1429  ;;  %v2699_v20 = vpop.permute.xlu2 %2698 }
 0x710   : > { %v2701_v21 = vunpack.i.h.bf16 %v2699_v20  ;;  %v2700_v23 = vunpack.i.l.bf16 %v2699_v20  ;;  %v1419_v24 = vpop.permute.xlu1 %1418 }
 0x712   : > { %v1546_v25 = vpack.c.bf16 %v2701_v21, %v2700_v23  ;;  %v2512_v23 = vld [vmem:[%s4050_s5 + $0x4] sm:$0xf]  ;;  %s700_s5 = scalar_lea.vmem [#allocation3], %s699_s2 }
 0x713   : > { %s2348_s15 = sshll.u32 %s700_s5, 4  ;;  %s2349_s15 = int_to_ptr.vmem [resolvable:$true] %s2348_s15 }
 0x714   : > { %1627 = vmatpush.bf16.msrb.mxu3 %v1546_v25 }
 0x717   : > { %v1520_v26 = vpop.permute.xlu0 %1519  ;;  %v2724_v28 = vpop.permute.xlu2 %2723 }
 0x718   : > { %v1412_v27 = vpop.permute.xlu1 %1411  ;;  %v2726_v35 = vunpack.i.h.bf16 %v2724_v28  ;;  %v2725_v36 = vunpack.i.l.bf16 %v2724_v28 }
 0x71a   : > { %v1543_v44 = vpack.c.bf16 %v2726_v35, %v2725_v36  ;;  %v2434_v35 = vld [vmem:[%s4051_s3] sm:$0xf]  ;;  %v2513_v36 = vld [vmem:[%s4051_s3 + $0x8] sm:$0xf0] }
 0x71f   : > { %v1448_v29 = vpop.permute.xlu0 %1447  ;;  %v2729_v22 = vpop.permute.xlu2 %2728 }
 0x720   : > { %v2704_v30 = vpop.permute.xlu1 %2703  ;;  %v2730_v43 = vunpack.i.l.bf16 %v2729_v22  ;;  %v2731_v48 = vunpack.i.h.bf16 %v2729_v22  ;;  %v2514_v22 = vld [vmem:[%s4051_s3 + $0x10] sm:$0xf0] }
 0x721   : > { %v2705_v31 = vunpack.i.l.bf16 %v2704_v30  ;;  %v2706_v32 = vunpack.i.h.bf16 %v2704_v30 }
 0x722   : > { %v1542_v50 = vpack.c.bf16 %v1455_v19, %v2730_v43  ;;  %v1541_v56 = vpack.c.bf16 %v1448_v29, %v2731_v48 }
 0x723   : > { %v1545_v33 = vpack.c.bf16 %v1473_v12, %v2705_v31  ;;  %v1544_v38 = vpack.c.bf16 %v1466_v6, %v2706_v32 }
 0x725   : > { %1628 = vmatpush.bf16.msrb.mxu3 %v1545_v33 }
 0x727   : > { %v2694_v37 = vpop.permute.xlu0 %2693  ;;  %v2739_v4 = vpop.permute.xlu2 %2738 }
 0x728   : > { %v2695_v39 = vunpack.i.l.bf16 %v2694_v37  ;;  %v2714_v40 = vpop.permute.xlu1 %2713  ;;  %v2696_v41 = vunpack.i.h.bf16 %v2694_v37  ;;  %v2741_v16 = vunpack.i.h.bf16 %v2739_v4  ;;  %v2740_v17 = vunpack.i.l.bf16 %v2739_v4 }
 0x729   : > { %1629 = vmatpush.bf16.msrb.mxu3 %v1544_v38  ;;  %v2716_v45 = vunpack.i.h.bf16 %v2714_v40  ;;  %v2715_v46 = vunpack.i.l.bf16 %v2714_v40  ;;  %v2435_v38 = vor.u32 %v2513_v36, %v2434_v35  ;;  %v1530_v40 = vld [vmem:[%s4051_s3 + $0x18] sm:$0xff] }
 0x72a   : > { %v1539_v42 = vpack.c.bf16 %v1437_v7, %v2695_v39  ;;  %v1538_v47 = vpack.c.bf16 %v1430_v10, %v2696_v41  ;;  %v1586_v43 = vunpack.c.h.b16 %v1530_v40 }
 0x72b   : > { %v1537_v54 = vpack.c.bf16 %v2716_v45, %v2715_v46  ;;  %v1585_v45 = vunpack.c.l.b16 %v1530_v40 }
 0x72c   : > { %1608 = vmatpush.bf16.msrb.mxu1 %v1539_v42 }
 0x72d   : > { %1630 = vmatpush.bf16.msrb.mxu3 %v1543_v44  ;;  %v1592_v44 = vpack.c.b16 %v1586_v43, %v1586_v43 }
 0x72f   : > { %v2709_v49 = vpop.permute.xlu0 %2708  ;;  %v1502_v25 = vpop.permute.xlu2 %1501 }
 0x730   : > { %v2710_v51 = vunpack.i.l.bf16 %v2709_v49  ;;  %v2734_v52 = vpop.permute.xlu1 %2733  ;;  %1609 = vmatpush.bf16.msrb.mxu1 %v1538_v47  ;;  %v2711_v55 = vunpack.i.h.bf16 %v2709_v49  ;;  %v1531_v47 = vld [vmem:[%s4051_s3 + $0x20] sm:$0xf] }
 0x731   : > { %1631 = vmatpush.bf16.msrb.mxu3 %v1542_v50  ;;  %v2736_v0 = vunpack.i.h.bf16 %v2734_v52  ;;  %v2735_v1 = vunpack.i.l.bf16 %v2734_v52  ;;  %v1591_v52 = vpack.c.b16 %v1585_v45, %v1585_v45  ;;  %v1841_v45 = vld [vmem:[%s3932_s10 + $0x8] sm:$0xff] }
 0x732   : > { %v1554_v53 = vpack.c.bf16 %v2710_v51, %v2710_v51  ;;  %v1553_v62 = vpack.c.bf16 %v1520_v26, %v2711_v55  ;;  %v1534_v26 = vpack.c.bf16 %v2741_v16, %v2740_v17 }
 0x733   : > { %v1552_v12 = vpack.c.bf16 %v2736_v0, %v2735_v1 }
 0x734   : > { %1610 = vmatpush.bf16.msrb.mxu1 %v1537_v54  ;;  %v1606_v60 = vsel %vm1074_vm6, %v1554_v53, 0  ;;  %v1587_v53 = vunpack.c.l.b16 %v1531_v47 }
 0x735   : > { %1632 = vmatpush.bf16.msrb.mxu3 %v1541_v56  ;;  %1645 = vmatpush.bf16.msra.mxu0 %v1606_v60 }
 0x737   : > { %v2719_v3 = vpop.permute.xlu0 %2718  ;;  %v1491_v39 = vpop.permute.xlu2 %1490 }
 0x738   : > { %v2720_v5 = vunpack.i.l.bf16 %v2719_v3  ;;  %v2744_v8 = vpop.permute.xlu1 %2743  ;;  %v2721_v9 = vunpack.i.h.bf16 %v2719_v3 }
 0x739   : > { %1646 = vmatpush.bf16.msra.mxu0 %v1553_v62  ;;  %v2745_v14 = vunpack.i.l.bf16 %v2744_v8  ;;  %v2746_v19 = vunpack.i.h.bf16 %v2744_v8  ;;  %v1593_v62 = vpack.c.b16 %v1587_v53, %v1587_v53 }
 0x73a   : > { %v1536_v11 = vpack.c.bf16 %v1419_v24, %v2720_v5  ;;  %v1535_v18 = vpack.c.bf16 %v1412_v27, %v2721_v9  ;;  %v2436_v24 = vld [vmem:[%s4051_s3 + $0xc] sm:$0xf0] }
 0x73b   : > { %v1551_v6 = vpack.c.bf16 %v3557_v13, %v2745_v14  ;;  %v1550_v27 = vpack.c.bf16 %v1502_v25, %v2746_v19  ;;  %v2439_v13 = vor.u32 %v2512_v23, %v2436_v24 }
 0x73c   : > { %1611 = vmatpush.bf16.msrb.mxu1 %v1536_v11 }
 0x73d   : > { %1647 = vmatpush.bf16.msra.mxu0 %v1552_v12 }
 0x73f   : > { %v1401_v7 = vpop.permute.xlu0 %1400  ;;  %v1571_v25 = vpop.permute.xlu2 %1570 }
 0x740   : > { %v2749_v10 = vpop.permute.xlu1 %2748  ;;  %1612 = vmatpush.bf16.msrb.mxu1 %v1535_v18  ;;  %v2445_v29 = vpack.c.bf16 %v1401_v7, %v3523_v2  ;;  %v2442_v2 = vld [vmem:[%s4051_s3 + $0x8] sm:$0xf] }
 0x741   : > { %v2751_v20 = vunpack.i.h.bf16 %v2749_v10  ;;  %v2750_v21 = vunpack.i.l.bf16 %v2749_v10  ;;  %1648 = vmatpush.bf16.msra.mxu0 %v1551_v6  ;;  %v2443_v42 = vor.u32 %v2514_v22, %v2442_v2 }
 0x743   : > { %v1540_v28 = vpack.c.bf16 %v2751_v20, %v2750_v21 }
 0x744   : > { %1613 = vmatpush.bf16.msrb.mxu1 %v1534_v26 }
 0x745   : > { %1633 = vmatpush.bf16.msrb.mxu3 %v1540_v28  ;;  %1649 = vmatpush.bf16.msra.mxu0 %v1550_v27 }
 0x747   : > { %v2754_v30 = vpop.permute.xlu0 %2753 }
 0x748   : > { %v2756_v31 = vunpack.i.h.bf16 %v2754_v30  ;;  %v2755_v32 = vunpack.i.l.bf16 %v2754_v30  ;;  %v1486_v33 = vpop.permute.xlu1 %1485  ;;  %1634 = vmatmul.bf16.vlgmr.msrb.gmra.mxu3 %v2439_v13  ;;  %2446 = vmatpush.bf16.msk.msrb.mxu1 %vm2444_vm0, %v2445_v29  ;;  %vm1673_vm0 = vcmask 130048  }
 0x749   : > { %v1548_v41 = vpack.c.bf16 %v1491_v39, %v1486_v33 }
 0x74a   : > { %v1549_v37 = vpack.c.bf16 %v2756_v31, %v2755_v32 }
 0x74c   : > { %2449 = vmatpush.bf16.msk.msrb.mxu1 %vm2447_vm14, %v2448_v61  ;;  %1650 = vmatpush.bf16.msra.mxu0 %v1549_v37 }
 0x74f   : > { %1616 = vmatmul.bf16.vlgmr.msrb.gmra.mxu1 %v2435_v38  ;;  %v1561_v1 = vpop.permute.xlu0 %1560 }
 0x750   : > { %v1566_v61 = vpop.permute.xlu1 %1565  ;;  %1651 = vmatpush.bf16.msra.mxu0 %v1548_v41 }
 0x753   : > { %2450 = vmatmul.msk.bf16.vlgmr.msra.gmra.mxu0 %vm1598_vm5, %v2443_v42 }
 0x758   : > { %v2764_v46 = vpop.permute.xlu1 %2763  ;;  %1639 = vmatmul.bf16.gmra.mxu3 %v1592_v44 }
 0x759   : > { %v2766_v48 = vunpack.i.h.bf16 %v2764_v46  ;;  %v2765_v49 = vunpack.i.l.bf16 %v2764_v46 }
 0x75b   : > { %v3601_v50 = vsel %vm1730_vm10, 0.0, %v2766_v48  ;;  %v3604_v51 = vsel %vm1730_vm10, 0.0, %v2765_v49 }
 0x75c   : > { %v1743_v54 = vsel %vm1737_vm12, %v3601_v50, 0.0  ;;  %v1742_v55 = vsel %vm1737_vm12, %v3604_v51, 0.0  ;;  %v2464_v56 = vpack.c.bf16 %v3601_v50, %v3604_v51  ;;  %v2516_v50 = vld [vmem:[%s4054_s30 + $0x4] sm:$0xf0]  ;;  %v2515_v51 = vld [vmem:[%s4054_s30 + $0x4] sm:$0xf] }
 0x75d   : > { %v3612_v60 = vpack.i.bf16 %v1743_v54, %v1742_v55 }
 0x75f   : > { %2773 = vrot.lane.b32.xlu1 %v3612_v60, %s4043_s1  ;;  %1621 = vmatmul.bf16.gmra.mxu1 %v1591_v52 }
 0x763   : > { %2451 = vmatmul.msk.bf16.gmra.mxu0 %vm1598_vm5, %v1593_v62 }
 0x767   : > { %2778 = vrot.lane.b32.xlu1 %v3612_v60, %s4044_s23 }
 0x76f   : > { %2783 = vrot.lane.b32.xlu1 %v3612_v60, %s4045_s28 }
 0x7cb   : > { %v1635_v0 = vpop.f32.mrf.mxu3 }
 0x7cc   : > { %v1617_v3 = vpop.f32.mrf.mxu1 }
 0x7cd   : > { %v1618_v4 = vadd.f32 %v1617_v3, %v1561_v1 }
 0x7cf   : > { %v1636_v5 = vadd.f32 %v1635_v0, %v1618_v4  ;;  %v1840_v0 = vld [vmem:[%s3932_s10] sm:$0xff] }
 0x7d0   : > { %v1653_v8 = vpop.f32.mrf.mxu0 }
 0x7d1   : > { %v2774_v9 = vpop.permute.xlu1 %2773  ;;  %v1654_v11 = vadd.f32 %v1653_v8, %v1636_v5 }
 0x7d2   : > { %v2776_v12 = vunpack.i.h.bf16 %v2774_v9  ;;  %v2775_v14 = vunpack.i.l.bf16 %v2774_v9 }
 0x7d3   : > { %vm1662_vm13 = vcmp.ge.f32.partialorder %v1654_v11, 0.0  ;;  %v1665_v16 = vmul.f32 0.1, %v1654_v11  ;;  %v1637_v17 = vpop.f32.mrf.mxu3 }
 0x7d4   : > { %v1839_v18 = vpack.c.bf16 %v2776_v12, %v2775_v14  ;;  %v1619_v19 = vpop.f32.mrf.mxu1 }
 0x7d5   : > { %v1668_v6 = vsel %vm1662_vm13, %v1654_v11, %v1665_v16  ;;  %v1620_v7 = vadd.f32 %v1619_v19, %v1566_v61  ;;  %vm3678_vm13 = vmpackc.low %vm1737_vm12, %vm1737_vm12 }
 0x7d6   : > { %1898 = vmatpush.bf16.msra.mxu3 %v1839_v18  ;;  %2452 = vmatmul.msk.f32.vlgmr.msra.gmra.mxu2 %vm1673_vm0, %v1668_v6 }
 0x7d7   : > { %v1638_v10 = vadd.f32 %v1637_v17, %v1620_v7 }
 0x7d8   : > { %v1655_v20 = vpop.f32.mrf.mxu0 }
 0x7d9   : > { %v1656_v21 = vadd.f32 %v1655_v20, %v1638_v10  ;;  %v2779_v8 = vpop.permute.xlu1 %2778 }
 0x7da   : > { %v2781_v16 = vunpack.i.h.bf16 %v2779_v8  ;;  %v2780_v17 = vunpack.i.l.bf16 %v2779_v8 }
 0x7db   : > { %v1666_v23 = vmul.f32 0.1, %v1656_v21  ;;  %v1640_v24 = vpop.f32.mrf.mxu3  ;;  %vm1663_vm14 = vcmp.ge.f32.partialorder %v1656_v21, 0.0 }
 0x7dc   : > { %v1622_v26 = vpop.f32.mrf.mxu1  ;;  %v1830_v10 = vpack.c.bf16 %v2781_v16, %v2780_v17 }
 0x7dd   : > { %v1623_v27 = vadd.f32 %v1622_v26, %v1571_v25  ;;  %v1669_v28 = vsel %vm1663_vm14, %v1656_v21, %v1666_v23  ;;  %vm1986_vm14 = vcmask 539648  }
 0x7de   : > { %2453 = vmatmul.msk.f32.gmra.mxu2 %vm1673_vm0, %v1669_v28 }
 0x7df   : > { %v1641_v13 = vadd.f32 %v1640_v24, %v1623_v27 }
 0x7e0   : > { %v1658_v29 = vpop.f32.mrf.mxu0 }
 0x7e1   : > { %v1659_v30 = vadd.f32 %v1658_v29, %v1641_v13  ;;  %v2784_v24 = vpop.permute.xlu1 %2783 }
 0x7e2   : > { %v2786_v25 = vunpack.i.h.bf16 %v2784_v24  ;;  %v2785_v26 = vunpack.i.l.bf16 %v2784_v24 }
 0x7e3   : > { %v1667_v31 = vmul.f32 0.1, %v1659_v30  ;;  %v1642_v32 = vpop.f32.mrf.mxu3  ;;  %vm1664_vm5 = vcmp.ge.f32.partialorder %v1659_v30, 0.0 }
 0x7e4   : > { %v1624_v33 = vpop.f32.mrf.mxu1 }
 0x7e5   : > { %v1670_v35 = vsel %vm1664_vm5, %v1659_v30, %v1667_v31  ;;  %v1836_v31 = vpack.c.bf16 %v2786_v25, %v2785_v26  ;;  %vm2488_vm5 = vmpackc.low %vm1986_vm14, %vm1986_vm14 }
 0x7e6   : > { %2454 = vmatmul.msk.f32.gmra.mxu2 %vm1673_vm0, %v1670_v35 }
 0x7e8   : > { %v1660_v36 = vpop.f32.mrf.mxu0 }
 0x859   : > { %v1700_v37 = vpop.f32.mrf.mxu2 }
 0x861   : > { %v1703_v38 = vpop.f32.mrf.mxu2 }
 0x862   : > { %v2767_v2 = vpack.i.bf16 %v1703_v38, %v1700_v37 }
 0x864   : > { %2768 = vrot.lane.b32.xlu2 %v2767_v2, %s3045_s27  ;;  %v1927_v2 = vld [vmem:[%s3943_s21 + $0x18] sm:$0xff] }
 0x865   : > { %1949 = vmatpush.msrb.mxu0 %v1927_v2 }
 0x869   : > { %v1706_v22 = vpop.f32.mrf.mxu2 }
 0x86a   : > { %v2757_v39 = vpack.i.bf16 %v3490_v34, %v1706_v22  ;;  %v1926_v22 = vld [vmem:[%s3943_s21 + $0x10] sm:$0xff] }
 0x86b   : > { %1950 = vmatpush.msrb.mxu0 %v1926_v22 }
 0x86c   : > { %2758 = vrot.lane.b32.xlu0 %v2757_v39, %s3045_s27 }
 0x8be   : > { %v2769_v40 = vpop.permute.xlu2 %2768 }
 0x8bf   : > { %v2771_v41 = vunpack.i.h.bf16 %v2769_v40  ;;  %v2770_v42 = vunpack.i.l.bf16 %v2769_v40 }
 0x8c1   : > { %v3628_v57 = vsel %vm1730_vm10, 0.0, %v2771_v41  ;;  %v3631_v59 = vsel %vm1730_vm10, 0.0, %v2770_v42 }
 0x8c2   : > { %v1739_v61 = vsel %vm1737_vm12, %v3628_v57, 0.0  ;;  %v1738_v43 = vsel %vm1737_vm12, %v3631_v59, 0.0  ;;  %v2470_v34 = vpack.c.bf16 %v3628_v57, %v3631_v59  ;;  %v1924_v57 = vld [vmem:[%s3943_s21] sm:$0xff] }
 0x8c3   : > { %v2822_v44 = vpack.i.bf16 %v1739_v61, %v1738_v43 }
 0x8c5   : > { %2823 = vrot.lane.b32.xlu1 %v2822_v44, %s4045_s28  ;;  %2788 = vrot.lane.b32.xlu2 %v2822_v44, %s4041_s29 }
 0x8cd   : > { %1850 = vperm.xlu1 %2605, %v1841_v45   ;;  %2793 = vrot.lane.b32.xlu2 %v2822_v44, %s4043_s1 }
 0x8d5   : > { %2798 = vrot.lane.b32.xlu2 %v2822_v44, %s4044_s23  ;;  %v1925_v44 = vld [vmem:[%s3943_s21 + $0x8] sm:$0xff] }
 0x8d6   : > { %1951 = vmatpush.msrb.mxu0 %v1925_v44 }
 0x8d8   : > { %1952 = vmatpush.msrb.mxu0 %v1924_v57 }
 0x8dd   : > { %2828 = vrot.lane.b32.xlu2 %v3612_v60, %s4041_s29  ;;  %v1842_v60 = vld [vmem:[%s3932_s10 + $0x10] sm:$0xff] }
 0x8de   : > { %v2759_v46 = vpop.permute.xlu0 %2758 }
 0x8df   : > { %v2761_v47 = vunpack.i.h.bf16 %v2759_v46  ;;  %v2760_v48 = vunpack.i.l.bf16 %v2759_v46 }
 0x8e1   : > { %v3649_v49 = vsel %vm1730_vm10, 0.0, %v2761_v47  ;;  %v3652_v52 = vsel %vm1730_vm10, 0.0, %v2760_v48 }
 0x8e2   : > { %v1741_v53 = vsel %vm1737_vm12, %v3649_v49, 0.0  ;;  %v1740_v54 = vsel %vm1737_vm12, %v3652_v52, 0.0  ;;  %v2467_v55 = vpack.c.bf16 %v3649_v49, %v3652_v52  ;;  %v1824_v49 = vld [vmem:[%s4054_s30 + $0x10] sm:$0xff] }
 0x8e3   : > { %v2802_v62 = vpack.i.bf16 %v1741_v53, %v1740_v54  ;;  %v2457_v53 = vld [vmem:[%s4054_s30] sm:$0xf]  ;;  %v1865_v52 = vunpack.c.l.b16 %v1824_v49 }
 0x8e5   : > { %1855 = vperm.xlu2 %2604, %v1842_v60   ;;  %2803 = vrot.lane.b32.xlu0 %v2802_v62, %s4041_s29  ;;  %v2458_v60 = vor.u32 %v2516_v50, %v2457_v53  ;;  %v2073_v50 = vld [vmem:[%s4055_s0 + $0x8] sm:$0xff] }
 0x8ed   : > { %2808 = vrot.lane.b32.xlu0 %v2802_v62, %s4043_s1 }
 0x8f5   : > { %2813 = vrot.lane.b32.xlu0 %v2802_v62, %s4044_s23 }
 0x8fd   : > { %2818 = vrot.lane.b32.xlu0 %v2802_v62, %s4045_s28 }
 0x905   : > { %1845 = vperm.xlu0 %2606, %v1840_v0   ;;  %v1869_v0 = vpack.c.b16 %v1865_v52, %v1865_v52 }
 0x91f   : > { %v2789_v1 = vpop.permute.xlu2 %2788 }
 0x920   : > { %v2791_v9 = vunpack.i.h.bf16 %v2789_v1  ;;  %v2790_v11 = vunpack.i.l.bf16 %v2789_v1 }
 0x922   : > { %v1831_v18 = vpack.c.bf16 %v2791_v9, %v2790_v11 }
 0x927   : > { %v2794_v14 = vpop.permute.xlu2 %2793 }
 0x928   : > { %v2796_v20 = vunpack.i.h.bf16 %v2794_v14  ;;  %v2795_v21 = vunpack.i.l.bf16 %v2794_v14 }
 0x92a   : > { %v1837_v27 = vpack.c.bf16 %v2796_v20, %v2795_v21 }
 0x92f   : > { %v2799_v28 = vpop.permute.xlu2 %2798 }
 0x930   : > { %v2801_v32 = vunpack.i.h.bf16 %v2799_v28  ;;  %v2800_v33 = vunpack.i.l.bf16 %v2799_v28 }
 0x932   : > { %v1828_v36 = vpack.c.bf16 %v2801_v32, %v2800_v33 }
 0x937   : > { %v2824_v37 = vpop.permute.xlu1 %2823  ;;  %v2829_v45 = vpop.permute.xlu2 %2828 }
 0x938   : > { %v2826_v42 = vunpack.i.h.bf16 %v2824_v37  ;;  %v2825_v61 = vunpack.i.l.bf16 %v2824_v37  ;;  %v2831_v47 = vunpack.i.h.bf16 %v2829_v45  ;;  %v2830_v48 = vunpack.i.l.bf16 %v2829_v45 }
 0x93a   : > { %v1834_v46 = vpack.c.bf16 %v2826_v42, %v2825_v61  ;;  %v1833_v54 = vpack.c.bf16 %v2831_v47, %v2830_v48 }
 0x957   : > { %v2804_v3 = vpop.permute.xlu0 %2803 }
 0x958   : > { %v2806_v4 = vunpack.i.h.bf16 %v2804_v3  ;;  %v2805_v5 = vunpack.i.l.bf16 %v2804_v3 }
 0x95a   : > { %v1832_v12 = vpack.c.bf16 %v2806_v4, %v2805_v5 }
 0x95c   : > { %1879 = vmatpush.bf16.msra.mxu1 %v1832_v12  ;;  %v1851_v12 = vpop.permute.xlu1 %1850 }
 0x95f   : > { %v2809_v19 = vpop.permute.xlu0 %2808 }
 0x960   : > { %v2811_v6 = vunpack.i.h.bf16 %v2809_v19  ;;  %v2810_v7 = vunpack.i.l.bf16 %v2809_v19  ;;  %1880 = vmatpush.bf16.msra.mxu1 %v1831_v18 }
 0x962   : > { %v1838_v23 = vpack.c.bf16 %v2811_v6, %v2810_v7  ;;  %v1856_v7 = vpop.permute.xlu2 %1855 }
 0x964   : > { %1881 = vmatpush.bf16.msra.mxu1 %v1830_v10  ;;  %1899 = vmatpush.bf16.msra.mxu3 %v1838_v23 }
 0x967   : > { %v2814_v13 = vpop.permute.xlu0 %2813 }
 0x968   : > { %v2816_v29 = vunpack.i.h.bf16 %v2814_v13  ;;  %v2815_v30 = vunpack.i.l.bf16 %v2814_v13  ;;  %1900 = vmatpush.bf16.msra.mxu3 %v1837_v27 }
 0x96a   : > { %v1829_v35 = vpack.c.bf16 %v2816_v29, %v2815_v30 }
 0x96c   : > { %1882 = vmatpush.bf16.msra.mxu1 %v1829_v35  ;;  %1901 = vmatpush.bf16.msra.mxu3 %v1836_v31 }
 0x96f   : > { %v2819_v38 = vpop.permute.xlu0 %2818 }
 0x970   : > { %v2821_v39 = vunpack.i.h.bf16 %v2819_v38  ;;  %v2820_v40 = vunpack.i.l.bf16 %v2819_v38  ;;  %1883 = vmatpush.bf16.msra.mxu1 %v1828_v36 }
 0x972   : > { %v1835_v43 = vpack.c.bf16 %v2821_v39, %v2820_v40 }
 0x974   : > { %2465 = vmatpush.bf16.msk.msra.mxu1 %vm3678_vm13, %v2464_v56  ;;  %1902 = vmatpush.bf16.msra.mxu3 %v1835_v43  ;;  %v2459_v56 = vld [vmem:[%s4054_s30 + $0x8] sm:$0xf0] }
 0x975   : > { %v2462_v62 = vor.u32 %v2515_v51, %v2459_v56  ;;  %v2072_v51 = vld [vmem:[%s4055_s0] sm:$0xff] }
 0x978   : > { %2468 = vmatpush.bf16.msk.msra.mxu1 %vm3678_vm13, %v2467_v55  ;;  %1903 = vmatpush.bf16.msra.mxu3 %v1834_v46  ;;  %v1866_v55 = vunpack.c.h.b16 %v1824_v49 }
 0x97a   : > { %v1870_v1 = vpack.c.b16 %v1866_v55, %v1866_v55 }
 0x97c   : > { %2471 = vmatpush.bf16.msk.msra.mxu1 %vm3678_vm13, %v2470_v34  ;;  %1904 = vmatpush.bf16.msra.mxu3 %v1833_v54  ;;  %v1846_v34 = vpop.permute.xlu0 %1845  ;;  %vm2093_vm13 = vcmask 588800  }
 0x97f   : > { %1887 = vmatmul.bf16.vlgmr.msra.gmra.mxu1 %v2458_v60  ;;  %2472 = vmatmul.msk.bf16.vlgmr.msra.gmra.mxu3 %vm1286_vm15, %v2462_v62 }
 0x98f   : > { %1892 = vmatmul.bf16.gmra.mxu1 %v1869_v0  ;;  %2473 = vmatmul.msk.bf16.gmra.mxu3 %vm1286_vm15, %v1870_v1 }
 0x9fc   : > { %v1888_v59 = vpop.f32.mrf.mxu1 }
 0x9fd   : > { %v1889_v3 = vadd.f32 %v1888_v59, %v1846_v34 }
 0xa02   : > { %v1906_v4 = vpop.f32.mrf.mxu3 }
 0xa03   : > { %v1907_v5 = vadd.f32 %v1906_v4, %v1889_v3 }
 0xa04   : > { %v1890_v8 = vpop.f32.mrf.mxu1 }
 0xa05   : > { %vm1915_vm12 = vcmp.ge.f32.partialorder %v1907_v5, 0.0  ;;  %v1918_v9 = vmul.f32 0.1, %v1907_v5  ;;  %v1891_v14 = vadd.f32 %v1890_v8, %v1851_v12 }
 0xa07   : > { %v1921_v11 = vsel %vm1915_vm12, %v1907_v5, %v1918_v9 }
 0xa08   : > { %2474 = vmatmul.msk.f32.vlgmr.msrb.gmra.mxu0 %vm1342_vm9, %v1921_v11 }
 0xa0a   : > { %v1908_v16 = vpop.f32.mrf.mxu3 }
 0xa0b   : > { %v1909_v17 = vadd.f32 %v1908_v16, %v1891_v14 }
 0xa0c   : > { %v1893_v18 = vpop.f32.mrf.mxu1 }
 0xa0d   : > { %v1919_v19 = vmul.f32 0.1, %v1909_v17  ;;  %vm1916_vm15 = vcmp.ge.f32.partialorder %v1909_v17, 0.0  ;;  %v1894_v10 = vadd.f32 %v1893_v18, %v1856_v7 }
 0xa0f   : > { %v1922_v6 = vsel %vm1916_vm15, %v1909_v17, %v1919_v19 }
 0xa10   : > { %2475 = vmatmul.msk.f32.gmra.mxu0 %vm1342_vm9, %v1922_v6 }
 0xa12   : > { %v1911_v20 = vpop.f32.mrf.mxu3 }
 0xa13   : > { %v1912_v21 = vadd.f32 %v1911_v20, %v1894_v10 }
 0xa14   : > { %v1895_v23 = vpop.f32.mrf.mxu1 }
 0xa15   : > { %v1920_v24 = vmul.f32 0.1, %v1912_v21  ;;  %vm1917_vm0 = vcmp.ge.f32.partialorder %v1912_v21, 0.0 }
 0xa17   : > { %v1923_v25 = vsel %vm1917_vm0, %v1912_v21, %v1920_v24 }
 0xa18   : > { %2476 = vmatmul.msk.f32.gmra.mxu0 %vm1342_vm9, %v1923_v25  ;;  %vm2485_vm9 = vmpackc.low %vm3044_vm7, %vm1986_vm14 }
 0xa1a   : > { %v1913_v26 = vpop.f32.mrf.mxu3 }
 0xa85   : > { %v1954_v27 = vpop.f32.mrf.mxu0 }
 0xa86   : > { %v2832_v28 = vpack.i.bf16 %v3416_v63, %v1954_v27 }
 0xa88   : > { %2833 = vrot.lane.b32.xlu0 %v2832_v28, %s3045_s27 }
 0xa8d   : > { %v1957_v13 = vpop.f32.mrf.mxu0 }
 0xa8e   : > { %1968 = vrot.lane.b32.xlu2 %v1957_v13, %s3045_s27 }
 0xa95   : > { %v1960_v29 = vpop.f32.mrf.mxu0 }
 0xa96   : > { %v2837_v30 = vpack.i.bf16 %v3412_v58, %v1960_v29  ;;  %v2479_v29 = vld [vmem:[%s4056_s9] sm:$0xf] }
 0xa98   : > { %2838 = vrot.lane.b32.xlu1 %v2837_v30, %s3045_s27  ;;  %v2518_v30 = vld [vmem:[%s4056_s9 + $0x4] sm:$0xf0] }
 0xae8   : > { %v1969_v31 = vpop.permute.xlu2 %1968 }
 0xae9   : > { %v3729_v35 = vsel %vm1730_vm10, 0.0, %v1969_v31  ;;  %v2141_v31 = vld [vmem:[%s4057_s7 + $0x38] sm:$0xff] }
 0xaea   : > { %v1988_v48 = vsel %vm1986_vm14, %v3729_v35, 0.0 }
 0xafa   : > { %v2834_v32 = vpop.permute.xlu0 %2833 }
 0xafb   : > { %v2835_v33 = vunpack.i.l.bf16 %v2834_v32  ;;  %v2836_v58 = vunpack.i.h.bf16 %v2834_v32 }
 0xafd   : > { %v3732_v36 = vsel %vm1730_vm10, 0.0, %v2835_v33  ;;  %v3740_v2 = vsel %vm1730_vm10, 0.0, %v2836_v58  ;;  %v2480_v58 = vor.u32 %v2518_v30, %v2479_v29 }
 0xafe   : > { %v2492_v63 = vpack.c.bf16 %v3729_v35, %v3732_v36  ;;  %v1987_v37 = vsel %vm1986_vm14, %v3732_v36, 0.0  ;;  %v1991_v42 = vsel %vm1986_vm14, %v3740_v2, 0.0  ;;  %v2139_v35 = vld [vmem:[%s4057_s7 + $0x28] sm:$0xff] }
 0xaff   : > { %2027 = vrot.lane.b32.xlu1 %v1987_v37, %s4045_s28 }
 0xb0a   : > { %v2839_v38 = vpop.permute.xlu1 %2838 }
 0xb0b   : > { %v2841_v22 = vunpack.i.h.bf16 %v2839_v38  ;;  %v2840_v39 = vunpack.i.l.bf16 %v2839_v38  ;;  %v2517_v38 = vld [vmem:[%s4056_s9 + $0x4] sm:$0xf] }
 0xb0d   : > { %v3743_v40 = vsel %vm1730_vm10, 0.0, %v2841_v22  ;;  %v3746_v41 = vsel %vm1730_vm10, 0.0, %v2840_v39  ;;  %v2140_v22 = vld [vmem:[%s4057_s7 + $0x30] sm:$0xff] }
 0xb0e   : > { %v1990_v61 = vsel %vm1986_vm14, %v3743_v40, 0.0  ;;  %v1989_v43 = vsel %vm1986_vm14, %v3746_v41, 0.0  ;;  %v2489_v44 = vpack.c.bf16 %v3743_v40, %v3746_v41  ;;  %v2137_v40 = vld [vmem:[%s4057_s7 + $0x18] sm:$0xff]  ;;  %v2136_v41 = vld [vmem:[%s4057_s7 + $0x10] sm:$0xff] }
 0xb0f   : > { %v2852_v45 = vpack.i.bf16 %v1991_v42, %v1990_v61  ;;  %v2842_v46 = vpack.i.bf16 %v1987_v37, %v1990_v61  ;;  %v2847_v47 = vpack.i.bf16 %v1989_v43, %v1991_v42  ;;  %v2857_v53 = vpack.i.bf16 %v1989_v43, %v1988_v48  ;;  %v2135_v42 = vld [vmem:[%s4057_s7 + $0x8] sm:$0xff]  ;;  %v2134_v61 = vld [vmem:[%s4057_s7] sm:$0xff] }
 0xb11   : > { %2853 = vrot.lane.b32.xlu1 %v2852_v45, %s4044_s23  ;;  %2843 = vrot.lane.b32.xlu2 %v2842_v46, %s4041_s29 }
 0xb12   : > { %2848 = vrot.lane.b32.xlu0 %v2847_v47, %s4041_s29 }
 0xb19   : > { %1997 = vrot.lane.b32.xlu1 %v1987_v37, %s4044_s23  ;;  %2858 = vrot.lane.b32.xlu2 %v2857_v53, %s4044_s23 }
 0xb1a   : > { %2014 = vrot.lane.b32.xlu0 %v1988_v48, %s4041_s29 }
 0xb21   : > { %2873 = vrot.lane.b32.xlu1 %v2852_v45, %s4045_s28  ;;  %2868 = vrot.lane.b32.xlu2 %v2842_v46, %s4043_s1 }
 0xb22   : > { %2863 = vrot.lane.b32.xlu0 %v2847_v47, %s4043_s1 }
 0xb29   : > { %2081 = vperm.xlu1 %2605, %v2073_v50   ;;  %2878 = vrot.lane.b32.xlu2 %v2857_v53, %s4045_s28 }
 0xb2a   : > { %2044 = vrot.lane.b32.xlu0 %v1988_v48, %s4043_s1 }
 0xb32   : > { %2076 = vperm.xlu0 %2606, %v2072_v51  }
 0xb6b   : > { %v2844_v54 = vpop.permute.xlu2 %2843 }
 0xb6c   : > { %v2845_v55 = vunpack.i.l.bf16 %v2844_v54  ;;  %v2846_v59 = vunpack.i.h.bf16 %v2844_v54 }
 0xb71   : > { %v2028_v56 = vpop.permute.xlu1 %2027 }
 0xb73   : > { %v2859_v34 = vpop.permute.xlu2 %2858 }
 0xb74   : > { %v2861_v8 = vunpack.i.h.bf16 %v2859_v34  ;;  %v2860_v9 = vunpack.i.l.bf16 %v2859_v34 }
 0xb76   : > { %v2062_v17 = vpack.c.bf16 %v2861_v8, %v2860_v9 }
 0xb7b   : > { %v2869_v18 = vpop.permute.xlu2 %2868 }
 0xb7c   : > { %v2870_v10 = vunpack.i.l.bf16 %v2869_v18  ;;  %v2871_v25 = vunpack.i.h.bf16 %v2869_v18  ;;  %v2327_v18 = vld [vmem:[#allocation2] sm:$0x1] }
 0xb83   : > { %v2854_v0 = vpop.permute.xlu1 %2853  ;;  %v2879_v13 = vpop.permute.xlu2 %2878 }
 0xb84   : > { %v2849_v60 = vpop.permute.xlu0 %2848  ;;  %v2856_v3 = vunpack.i.h.bf16 %v2854_v0  ;;  %v2855_v4 = vunpack.i.l.bf16 %v2854_v0  ;;  %v2881_v32 = vunpack.i.h.bf16 %v2879_v13  ;;  %v2880_v33 = vunpack.i.l.bf16 %v2879_v13 }
 0xb85   : > { %v2850_v62 = vunpack.i.l.bf16 %v2849_v60  ;;  %v2851_v49 = vunpack.i.h.bf16 %v2849_v60 }
 0xb86   : > { %v2063_v11 = vpack.c.bf16 %v2856_v3, %v2855_v4  ;;  %v2067_v39 = vpack.c.bf16 %v2881_v32, %v2880_v33 }
 0xb87   : > { %v2066_v52 = vpack.c.bf16 %v2028_v56, %v2850_v62  ;;  %v2065_v1 = vpack.c.bf16 %v2845_v55, %v2851_v49 }
 0xb89   : > { %2100 = vmatpush.bf16.msrb.mxu2 %v2066_v52 }
 0xb8b   : > { %v1998_v12 = vpop.permute.xlu1 %1997 }
 0xb8c   : > { %v2015_v57 = vpop.permute.xlu0 %2014  ;;  %v2486_v20 = vpack.c.bf16 %v1998_v12, %v3740_v2  ;;  %v2481_v2 = vld [vmem:[%s4056_s9 + $0x8] sm:$0xf0] }
 0xb8d   : > { %2101 = vmatpush.bf16.msrb.mxu2 %v2065_v1  ;;  %v2064_v5 = vpack.c.bf16 %v2015_v57, %v2846_v59  ;;  %v2484_v36 = vor.u32 %v2517_v38, %v2481_v2 }
 0xb91   : > { %2102 = vmatpush.bf16.msrb.mxu2 %v2064_v5 }
 0xb93   : > { %v2874_v23 = vpop.permute.xlu1 %2873 }
 0xb94   : > { %v2864_v14 = vpop.permute.xlu0 %2863  ;;  %v2876_v26 = vunpack.i.h.bf16 %v2874_v23  ;;  %v2875_v27 = vunpack.i.l.bf16 %v2874_v23 }
 0xb95   : > { %v2865_v16 = vunpack.i.l.bf16 %v2864_v14  ;;  %2103 = vmatpush.bf16.msrb.mxu2 %v2063_v11  ;;  %v2866_v6 = vunpack.i.h.bf16 %v2864_v14 }
 0xb96   : > { %v2068_v37 = vpack.c.bf16 %v2876_v26, %v2875_v27 }
 0xb97   : > { %v2071_v19 = vpack.c.bf16 %v2865_v16, %v2865_v16  ;;  %v2070_v21 = vpack.c.bf16 %v2870_v10, %v2866_v6  ;;  %v2305_v16 = vld [vmem:[%s4058_s24 + $0x8] sm:$0x1]  ;;  %s2346_s24 = scalar_lea.hbm %s4066_s4, %s4064_s11 }
 0xb99   : > { %2104 = vmatpush.bf16.msrb.mxu2 %v2062_v17  ;;  %v2098_v7 = vsel %vm1074_vm6, %v2071_v19, 0  ;;  %v2276_v17 = vld [vmem:[%s4060_s22] sm:$0xff]  ;;  %s2350_s22 = sshll.u32 %s2346_s24, 4  ;;  %s2351_s22 = int_to_ptr.hbm [resolvable:$true] %s2350_s22 }
 0xb9a   : > { %2117 = vmatpush.bf16.msra.mxu0 %v2098_v7  ;;  %v2304_v19 = vld [vmem:[%s4059_s6] sm:$0xff]  ;;  %s2964_s16 = sshra.s32 %s2351_s22, 4  ;;  %s2965_s16 = int_to_ptr.hbm [resolvable:$true] %s2964_s16 }
 0xb9b   : > { %v2082_v50 = vpop.permute.xlu1 %2081  ;;  %p2971_p0 = scmp.lt.s32.totalorder %s2965_s16, %s4066_s4 }
 0xb9c   : > { %v2045_v24 = vpop.permute.xlu0 %2044 }
 0xb9d   : > { %2487 = vmatpush.bf16.msk.msrb.mxu2 %vm2485_vm9, %v2486_v20  ;;  %v2069_v28 = vpack.c.bf16 %v2045_v24, %v2871_v25 }
 0xb9e   : > { %2118 = vmatpush.bf16.msra.mxu0 %v2070_v21 }
 0xba1   : > { %2490 = vmatpush.bf16.msk.msrb.mxu2 %vm2488_vm5, %v2489_v44 }
 0xba2   : > { %2119 = vmatpush.bf16.msra.mxu0 %v2069_v28 }
 0xba4   : > { %v2077_v43 = vpop.permute.xlu0 %2076 }
 0xba5   : > { %2493 = vmatpush.bf16.msk.msrb.mxu2 %vm2488_vm5, %v2492_v63  ;;  %v2138_v63 = vld [vmem:[%s4057_s7 + $0x20] sm:$0xff] }
 0xba6   : > { %2120 = vmatpush.bf16.msra.mxu0 %v2068_v37 }
 0xba8   : > { %2108 = vmatmul.bf16.vlgmr.msrb.gmra.mxu2 %v2480_v58 }
 0xba9   : > { %2156 = vmatpush.msra.mxu2 %v2141_v31 }
 0xbaa   : > { %2121 = vmatpush.bf16.msra.mxu0 %v2067_v39 }
 0xbab   : > { %2157 = vmatpush.msra.mxu2 %v2140_v22 }
 0xbad   : > { %2158 = vmatpush.msra.mxu2 %v2139_v35  ;;  %2494 = vmatmul.msk.bf16.vlgmr.msra.gmra.mxu0 %vm2093_vm13, %v2484_v36 }
 0xbaf   : > { %2159 = vmatpush.msra.mxu2 %v2138_v63 }
 0xbb1   : > { %2160 = vmatpush.msra.mxu2 %v2137_v40 }
 0xbb3   : > { %2161 = vmatpush.msra.mxu2 %v2136_v41 }
 0xbb5   : > { %2162 = vmatpush.msra.mxu2 %v2135_v42 }
 0xbb7   : > { %2163 = vmatpush.msra.mxu2 %v2134_v61 }
 0xc2a   : > { %v2123_v44 = vpop.f32.mrf.mxu0 }
 0xc2b   : > { %v2109_v45 = vpop.f32.mrf.mxu2 }
 0xc2c   : > { %v2110_v46 = vadd.f32 %v2109_v45, %v2077_v43 }
 0xc2e   : > { %v2124_v47 = vadd.f32 %v2123_v44, %v2110_v46 }
 0xc30   : > { %vm2128_vm12 = vcmp.ge.f32.partialorder %v2124_v47, 0.0  ;;  %v2130_v48 = vmul.f32 0.1, %v2124_v47 }
 0xc32   : > { %v2132_v53 = vsel %vm2128_vm12, %v2124_v47, %v2130_v48  ;;  %v2125_v54 = vpop.f32.mrf.mxu0 }
 0xc33   : > { %v2111_v51 = vpop.f32.mrf.mxu2  ;;  %2495 = vmatmul.msk.f32.vlgmr.msra.gmra.mxu2 %vm1106_vm11, %v2132_v53 }
 0xc34   : > { %v2112_v56 = vadd.f32 %v2111_v51, %v2082_v50 }
 0xc36   : > { %v2126_v60 = vadd.f32 %v2125_v54, %v2112_v56 }
 0xc38   : > { %vm2129_vm15 = vcmp.ge.f32.partialorder %v2126_v60, 0.0  ;;  %v2131_v62 = vmul.f32 0.1, %v2126_v60 }
 0xc3a   : > { %v2133_v49 = vsel %vm2129_vm15, %v2126_v60, %v2131_v62 }
 0xc3b   : > { %2496 = vmatmul.msk.f32.gmra.mxu2 %vm1106_vm11, %v2133_v49 }
 0xcb6   : > { %v2165_v52 = vpop.f32.mrf.mxu2 }
 0xcb7   : > { %v2882_v55 = vpack.i.bf16 %v2165_v52, %v3351_v15 }
 0xcb9   : > { %2883 = vrot.lane.b32.xlu2 %v2882_v55, %s3045_s27 }
 0xcbe   : > { %v2168_v0 = vpop.f32.mrf.mxu2 }
 0xcbf   : > { %2176 = vrot.lane.b32.xlu0 %v2168_v0, %s3045_s27 }
 0xd13   : > { %v2884_v1 = vpop.permute.xlu2 %2883 }
 0xd14   : > { %v3828_v57 = vunpack.i.l.bf16 %v2884_v1  ;;  %v3834_v4 = vunpack.i.h.bf16 %v2884_v1 }
 0xd16   : > { %v2185_v59 = vsel %vm1730_vm10, 0.0, %v3828_v57  ;;  %v2188_v34 = vsel %vm1730_vm10, %v3828_v57, 0.0  ;;  %v2183_v15 = vsel %vm1730_vm10, 0.0, %v3834_v4  ;;  %v2186_v5 = vsel %vm1730_vm10, %v3834_v4, 0.0 }
 0xd17   : > { %v2892_v3 = vpack.i.bf16 %v2188_v34, %v2185_v59  ;;  %v2897_v8 = vpack.i.bf16 %v2186_v5, %v2183_v15 }
 0xd19   : > { %2893 = vrot.lane.b32.xlu2 %v2892_v3, %s4045_s28  ;;  %2888 = vrot.lane.b32.xlu1 %v2892_v3, %s4043_s1 }
 0xd21   : > { %2898 = vrot.lane.b32.xlu2 %v2897_v8, %s4043_s1 }
 0xd29   : > { %2923 = vrot.lane.b32.xlu2 %v2897_v8, %s4041_s29 }
 0xd31   : > { %2938 = vrot.lane.b32.xlu2 %v2892_v3, %s4044_s23  ;;  %v3845_v9 = vpop.permute.xlu0 %2176 }
 0xd32   : > { %v2184_v11 = vsel %vm1730_vm10, 0.0, %v3845_v9  ;;  %v2187_v12 = vsel %vm1730_vm10, %v3845_v9, 0.0 }
 0xd33   : > { %v2912_v14 = vpack.i.bf16 %v2187_v12, %v2184_v11 }
 0xd35   : > { %2913 = vrot.lane.b32.xlu1 %v2912_v14, %s4045_s28  ;;  %2903 = vrot.lane.b32.xlu0 %v2912_v14, %s4043_s1  ;;  %s2338_s1 = scalar_lea.sflag [#allocation4], %s699_s2 }
 0xd39   : > { %2313 = vperm.xlu2 %2604, %v2305_v16   ;;  %v2267_v16 = vld [vmem:[%s4062_s14] sm:$0xf]  ;;  %s2970_s14 = scalar_lea.hbm %s4066_s4, 2 }
 0xd3d   : > { %2918 = vrot.lane.b32.xlu1 %v2897_v8, %s4045_s28  ;;  %2908 = vrot.lane.b32.xlu0 %v2892_v3, %s4041_s29 }
 0xd45   : > { %2933 = vrot.lane.b32.xlu1 %v2912_v14, %s4044_s23  ;;  %2928 = vrot.lane.b32.xlu0 %v2912_v14, %s4041_s29  ;;  %v2504_v14 = vpack.c.bf16 %v3845_v9, %v3834_v4 }
 0xd4d   : > { %2279 = vperm.xlu1 %2605, %v2276_v17   ;;  %2943 = vrot.lane.b32.xlu0 %v2897_v8, %s4044_s23  ;;  %s4061_s23 = sld [smem:[#allocation15_spill]] }
 0xd55   : > { %2330 = vperm.xlu1 %2605, %v2327_v18   ;;  %2308 = vperm.xlu0 %2606, %v2304_v19   ;;  %v705_v18 = vld [vmem:[%s4061_s23] sm:$0x1]  ;;  %s2966_s23 = scalar_lea.hbm %s2965_s16, 1 }
 0xd56   : > { %p2967_p11 = scmp.ne.s32.totalorder %s2965_s16, %s2966_s23  ;;  %p2972_p1 = scmp.lt.s32.totalorder %s2970_s14, %s2966_s23 }
 0xd58   : > { %p2968_p12 = pnand %p2967_p11, %p3207_p5  ;;  %p2973_p2 = por %p2972_p1, %p2971_p0 }
 0xd5a   : > { %p2969_p13 = pneg %p2968_p12 }
 0xd5c   : > { %p2974_p3 = pnand %p2973_p2, %p2969_p13 }
 0xd73   : > { %v2894_v24 = vpop.permute.xlu2 %2893 }
 0xd74   : > { %v2896_v33 = vunpack.i.h.bf16 %v2894_v24  ;;  %v2895_v37 = vunpack.i.l.bf16 %v2894_v24 }
 0xd76   : > { %v2245_v35 = vsel %vm775_vm3, %v2895_v37, %v2896_v33 }
 0xd7b   : > { %v2899_v25 = vpop.permute.xlu2 %2898 }
 0xd7c   : > { %v2901_v26 = vunpack.i.h.bf16 %v2899_v25  ;;  %v2900_v27 = vunpack.i.l.bf16 %v2899_v25 }
 0xd7e   : > { %v2261_v58 = vsel %vm791_vm4, %v2900_v27, %v2901_v26 }
 0xd83   : > { %v2924_v22 = vpop.permute.xlu2 %2923 }
 0xd84   : > { %v2926_v47 = vunpack.i.h.bf16 %v2924_v22  ;;  %v2925_v48 = vunpack.i.l.bf16 %v2924_v22 }
 0xd86   : > { %v2225_v55 = vsel %vm759_vm2, %v2925_v48, %v2926_v47 }
 0xd8b   : > { %v2889_v6 = vpop.permute.xlu1 %2888  ;;  %v2939_v53 = vpop.permute.xlu2 %2938 }
 0xd8c   : > { %v2891_v7 = vunpack.i.h.bf16 %v2889_v6  ;;  %v2890_v10 = vunpack.i.l.bf16 %v2889_v6  ;;  %v2941_v49 = vunpack.i.h.bf16 %v2939_v53  ;;  %v2940_v52 = vunpack.i.l.bf16 %v2939_v53 }
 0xd8e   : > { %v2263_v20 = vsel %vm791_vm4, %v2890_v10, %v2891_v7  ;;  %v2209_v34 = vsel %vm743_vm1, %v2940_v52, %v2941_v49 }
 0xd8f   : > { %v2275_v21 = vpack.c.bf16 %v2263_v20, %v2263_v20 }
 0xd91   : > { %v2286_v23 = vsel %vm1074_vm6, %v2275_v21, 0  ;;  %vm2318_vm6 = vcmask 1040384  }
 0xd92   : > { %2288 = vmatpush.bf16.msrb.mxu1 %v2286_v23 }
 0xd93   : > { %v2314_v17 = vpop.permute.xlu2 %2313 }
 0xd94   : > { %v2317_v10 = vmul.f32 %v2314_v17, %v705_v18 }
 0xd96   : > { %v2319_v21 = vsel %vm2318_vm6, %v2317_v10, 0.0 }
 0xda7   : > { %v2914_v28 = vpop.permute.xlu1 %2913  ;;  %v2904_v13 = vpop.permute.xlu0 %2903 }
 0xda8   : > { %v2916_v29 = vunpack.i.h.bf16 %v2914_v28  ;;  %v2915_v30 = vunpack.i.l.bf16 %v2914_v28  ;;  %v2906_v31 = vunpack.i.h.bf16 %v2904_v13  ;;  %v2905_v32 = vunpack.i.l.bf16 %v2904_v13 }
 0xdaa   : > { %v2262_v38 = vsel %vm791_vm4, %v2905_v32, %v2906_v31  ;;  %v2244_v39 = vsel %vm775_vm3, %v2915_v30, %v2916_v29 }
 0xdab   : > { %v2274_v2 = vpack.c.bf16 %v2262_v38, %v2261_v58  ;;  %v2273_v40 = vpack.c.bf16 %v2245_v35, %v2244_v39 }
 0xdad   : > { %2289 = vmatpush.bf16.msrb.mxu1 %v2274_v2 }
 0xdaf   : > { %v2919_v36 = vpop.permute.xlu1 %2918  ;;  %v2909_v63 = vpop.permute.xlu0 %2908 }
 0xdb0   : > { %v2921_v41 = vunpack.i.h.bf16 %v2919_v36  ;;  %v2920_v42 = vunpack.i.l.bf16 %v2919_v36  ;;  %v2911_v61 = vunpack.i.h.bf16 %v2909_v63  ;;  %v2910_v43 = vunpack.i.l.bf16 %v2909_v63 }
 0xdb1   : > { %2290 = vmatpush.bf16.msrb.mxu1 %v2273_v40 }
 0xdb2   : > { %v2227_v44 = vsel %vm759_vm2, %v2910_v43, %v2911_v61  ;;  %v2243_v45 = vsel %vm775_vm3, %v2920_v42, %v2921_v41  ;;  %vm2497_vm3 = vmneg %vm1730_vm10 }
 0xdb3   : > { %v2272_v46 = vpack.c.bf16 %v2243_v45, %v2227_v44  ;;  %vm2498_vm4 = vmpackc.low %vm3044_vm7, %vm2497_vm3 }
 0xdb5   : > { %2291 = vmatpush.bf16.msrb.mxu1 %v2272_v46 }
 0xdb7   : > { %v2934_v50 = vpop.permute.xlu1 %2933  ;;  %v2929_v51 = vpop.permute.xlu0 %2928 }
 0xdb8   : > { %v2936_v56 = vunpack.i.h.bf16 %v2934_v50  ;;  %v2935_v54 = vunpack.i.l.bf16 %v2934_v50  ;;  %v2931_v60 = vunpack.i.h.bf16 %v2929_v51  ;;  %v2930_v62 = vunpack.i.l.bf16 %v2929_v51 }
 0xdba   : > { %v2226_v0 = vsel %vm759_vm2, %v2930_v62, %v2931_v60  ;;  %v2208_v59 = vsel %vm743_vm1, %v2935_v54, %v2936_v56  ;;  %vm2503_vm2 = vmpackc.low %vm2497_vm3, %vm2497_vm3 }
 0xdbb   : > { %v2271_v1 = vpack.c.bf16 %v2226_v0, %v2225_v55  ;;  %v2270_v15 = vpack.c.bf16 %v2209_v34, %v2208_v59 }
 0xdbd   : > { %2292 = vmatpush.bf16.msrb.mxu1 %v2271_v1 }
 0xdbf   : > { %v2944_v3 = vpop.permute.xlu0 %2943  ;;  %v2280_v19 = vpop.permute.xlu1 %2279 }
 0xdc0   : > { %v2946_v5 = vunpack.i.h.bf16 %v2944_v3  ;;  %v2945_v8 = vunpack.i.l.bf16 %v2944_v3 }
 0xdc1   : > { %2293 = vmatpush.bf16.msrb.mxu1 %v2270_v15 }
 0xdc2   : > { %v2207_v11 = vsel %vm743_vm1, %v2945_v8, %v2946_v5 }
 0xdc3   : > { %v2499_v12 = vpack.c.bf16 %v2207_v11, %v3828_v57 }
 0xdc5   : > { %2500 = vmatpush.bf16.msk.msrb.mxu1 %vm2498_vm4, %v2499_v12 }
 0xdc7   : > { %v2309_v20 = vpop.permute.xlu0 %2308  ;;  %v2331_v13 = vpop.permute.xlu1 %2330 }
 0xdc8   : > { %v2333_v30 = vperm.slane %v2331_v13, 0 }
 0xdc9   : > { %2505 = vmatpush.bf16.msk.msrb.mxu1 %vm2503_vm2, %v2504_v14 }
 0xdcc   : > { %2506 = vmatmul.msk.bf16.vlgmr.msrb.gmra.mxu1 %vm855_vm8, %v2267_v16 }
 0xe49   : > { %v2297_v6 = vpop.f32.mrf.mxu1 }
 0xe4a   : > { %v2298_v7 = vadd.f32 %v2297_v6, %v2280_v19 }
 0xe4c   : > { %vm2301_vm1 = vcmp.ge.f32.partialorder %v2298_v7, 0.0  ;;  %v2302_v57 = vmul.f32 0.1, %v2298_v7 }
 0xe4e   : > { %v2303_v4 = vsel %vm2301_vm1, %v2298_v7, %v2302_v57 }
 0xe4f   : > { %v2316_v9 = vmul.f32 %v2309_v20, %v2303_v4 }
 0xe51   : > { %v2320_v23 = vadd.f32 %v2319_v21, %v2316_v9  ;;  %v2299_v24 = vpop.f32.mrf.mxu1 }
 0xe53   : > { %v2321_v25 = vrot.slane %v2320_v23, 4 }
 0xe55   : > { %v2322_v26 = vadd.f32 %v2321_v25, %v2320_v23 }
 0xe57   : > { %v2323_v27 = vrot.slane %v2322_v26, 2 }
 0xe59   : > { %v2324_v28 = vadd.f32 %v2323_v27, %v2322_v26 }
 0xe5b   : > { %v2325_v29 = vrot.slane %v2324_v28, 1 }
 0xe5d   : > { %v2326_v31 = vadd.f32 %v2325_v29, %v2324_v28 }
 0xe5f   : > { %v2334_v32 = vadd.f32 %v2333_v30, %v2326_v31 }
 0xe61   : > { %2948 = vtanh.f32 %v2334_v32 }
 0xe67   : > { %v2949_v33 = vpop.eup %2948 }
 0xe68   : > { %2336 = vst [vmem:[%s700_s5] sm:$0x1] %v2949_v33 }
 0xe69   : > { %2977 = shalt.err (!%p2974_p3)
}
 0xe6a   : > { %2519 = dma.vmem_to_hbm [thread:$0]  (%p3207_p5), %s2349_s15, 16, %s2351_s22, %s2338_s1  }
 0xe6b PF: > { %s4067_s2 = sld [smem:[#allocation9_spill]] }
 0xe6c   : > { %s4068_s17 = sld [smem:[#allocation6_spill]] }
 0xe71   : > { %p2525_p4 = scmp.ge.s32.totalorder %s4067_s2, 2 }
 0xe72   : > { %s2362_s24 = sand.u32 1, %s4068_s17  }
 0xe73   : > { %p2522_p7 = pnand %p2525_p4, %p3211_p6  ;;  %s2363_s5 = scalar_lea.sflag [#allocation4], %s2362_s24 }
 0xe75   : > { %p2523_p8 = pneg %p2522_p7 }
 0xe77   : > { %2995 = dma.done.wait (%p2523_p8), %s2363_s5, 16  }
 0xe78   : > { %2997 = vsyncadd (%p2523_p8), %s2363_s5, 4294967280  ;;  %s4070_s1 = sld [smem:[#allocation11_spill]] }
 0xe79   : > { %s4071_s24 = sld [smem:[#allocation7_spill]] }
 0xe7a   : > { %s4072_s25 = sld [smem:[#allocation8_spill]] }
 0xe7b   : > { %s4073_s5 = sld [smem:[#allocation12_spill]] }
 0xe7e   : > { %p35_p9 = scmp.ge.s32.totalorder %s4070_s1, 4  }
 0xe80   :  { %37 = sbr.rel (!%p35_p9) target bundleno = 21 (0x15), region = 147 }
 0xe85   :  { %2368 = vsyncpa [#allocation4], 1 }
 0xe86   :  { %2370 = vsyncpa [#allocation4 + $0x1], 1 }

</bundles_post_ra>
